<compile_context>
chip_gen: v5e
topology: v5e:2x2
jax: 0.10.0
libtpu: 0.0.40
codegen_flags: <defaults>
</compile_context>

<pallas_src>
import functools

import jax
import jax.numpy as jnp
from jax.experimental import pallas as pl
from jax.experimental.pallas import tpu as pltpu

# ---- small synthetic BERT config ----
VOCAB = 100
TYPE_VOCAB = 2
MAX_SEQ = 16          # resized position embeddings (MAX_SEQUENCE_LENGTH)
HIDDEN = 32
NUM_HEADS = 4
HEAD_DIM = HIDDEN // NUM_HEADS
INTERMEDIATE = 64
NUM_LAYERS = 2
NUM_LABELS = 3
LN_EPS = 1e-12
LANE = 128            # lane-dense padded width for the classifier output


# ------------------------------ fused kernel --------------------------------
# Grid = (batch, layer).  Per step: one encoder layer for one batch element.
#   layer == 0      : embedding LayerNorm -> activation scratch
#   every layer     : attention + FFN, activations carried in VMEM scratch
#   layer == last   : mean-pool + classifier -> lane-dense output slab

def _bert_layer_kernel(
    emb_ref, mask_ref,
    emb_ln_g_ref, emb_ln_b_ref,
    wqkv_ref, bqkv_ref, wo_ref, bo_ref,
    wi_ref, bi_ref, wf_ref, bf_ref,
    ln1_g_ref, ln1_b_ref, ln2_g_ref, ln2_b_ref,
    cls_w_ref, cls_b_ref,
    out_ref,
    x_scr,
    *, seq, hidden, num_heads, eps,
):
    head_dim = hidden // num_heads
    scale = 1.0 / (head_dim ** 0.5)
    bf16 = jnp.bfloat16
    l = pl.program_id(1)

    def layernorm(v, g, b):          # f32 elementwise (v5e-safe)
        mu = jnp.mean(v, axis=-1, keepdims=True)
        vc = v - mu
        var = jnp.mean(vc * vc, axis=-1, keepdims=True)
        return vc * jax.lax.rsqrt(var + eps) * g + b

    # Embedding LayerNorm once per batch element (embedding dropout p=0.1 is
    # identity at inference).
    @pl.when(l == 0)
    def _():
        x_scr[...] = layernorm(emb_ref[0], emb_ln_g_ref[...], emb_ln_b_ref[...])

    x = x_scr[...]                                   # (S, H) f32, VMEM-resident
    mask = mask_ref[...]                             # (1, 1, S) additive mask

    # ---- self-attention: all heads in one batched einsum chain (head axis is
    # ---- the leading batch dim of every dot_general; no per-head slicing or
    # ---- concatenation of 8-lane chunks) ----
    xb = jnp.broadcast_to(x.astype(bf16), (num_heads, seq, hidden))
    # fused per-head QKV projection: (heads, S, H) @ (heads, H, 3*dh)
    qkv = jnp.einsum("hsk,hkd->hsd", xb, wqkv_ref[0],
                     preferred_element_type=jnp.float32) + bqkv_ref[0]
    q = qkv[:, :, :head_dim]
    k = qkv[:, :, head_dim:2 * head_dim]
    v = qkv[:, :, 2 * head_dim:]

    s = jnp.einsum("hqd,hkd->hqk", q.astype(bf16), k.astype(bf16),
                   preferred_element_type=jnp.float32) * scale + mask
    s = s - jnp.max(s, axis=-1, keepdims=True)
    p = jnp.exp(s)                                                   # f32 softmax
    inv = pl.reciprocal(jnp.sum(p, axis=-1, keepdims=True), approx=True)
    p = p * inv

    ctx = jnp.einsum("hqk,hkd->hqd", p.astype(bf16), v.astype(bf16),
                     preferred_element_type=jnp.float32)             # (heads,S,dh)
    # Output projection with head-major weights: batched matmul + reduce over
    # heads == concat(heads) @ Wo, but with zero lane-stitching.
    attn = jnp.einsum("hqd,hdo->hqo", ctx.astype(bf16), wo_ref[0],
                      preferred_element_type=jnp.float32)            # (heads,S,H)
    attn = jnp.sum(attn, axis=0) + bo_ref[0]                         # (S, H)
    h1 = layernorm(x + attn, ln1_g_ref[0], ln1_b_ref[0])

    # ---- FFN ----
    inter = jnp.dot(h1.astype(bf16), wi_ref[0],
                    preferred_element_type=jnp.float32) + bi_ref[0]
    # TODO(synk): HF BERT default is exact erf-GELU; tanh approximation used
    # since erf lowering is not guaranteed in Mosaic.
    inter = jax.nn.gelu(inter, approximate=True)                     # f32
    ffn = jnp.dot(inter.astype(bf16), wf_ref[0],
                  preferred_element_type=jnp.float32) + bf_ref[0]
    x_new = layernorm(h1 + ffn, ln2_g_ref[0], ln2_b_ref[0])
    x_scr[...] = x_new                                               # carry to next layer

    # ---- mean-pool over sequence + classifier on the last layer step ----
    @pl.when(l == pl.num_programs(1) - 1)
    def _():
        pooled = jnp.mean(x_new, axis=0, keepdims=True)              # (1, H)
        # classifier-head dropout (p=0.2) is identity at inference
        logits = jnp.dot(pooled.astype(bf16), cls_w_ref[...],
                         preferred_element_type=jnp.float32) + cls_b_ref[...]
        out_ref[0] = logits.astype(out_ref.dtype)                    # (1, LANE)


# ------------------------------ parameters ---------------------------------

def init_params(key):
    """Synthetic weights in conventional (in, out) math layout."""
    def normal(k, shape):
        return (0.02 * jax.random.normal(k, shape)).astype(jnp.float32)

    keys = iter(jax.random.split(key, 16))
    L, H, I = NUM_LAYERS, HIDDEN, INTERMEDIATE
    return {
        "word_emb": normal(next(keys), (VOCAB, H)),
        "pos_emb": normal(next(keys), (MAX_SEQ, H)),   # resized position embeddings
        "type_emb": normal(next(keys), (TYPE_VOCAB, H)),
        "emb_ln_g": jnp.ones((1, H), jnp.float32),
        "emb_ln_b": jnp.zeros((1, H), jnp.float32),
        "wq": normal(next(keys), (L, H, H)), "bq": jnp.zeros((L, H), jnp.float32),
        "wk": normal(next(keys), (L, H, H)), "bk": jnp.zeros((L, H), jnp.float32),
        "wv": normal(next(keys), (L, H, H)), "bv": jnp.zeros((L, H), jnp.float32),
        "wo": normal(next(keys), (L, H, H)), "bo": jnp.zeros((L, H), jnp.float32),
        "wi": normal(next(keys), (L, H, I)), "bi": jnp.zeros((L, I), jnp.float32),
        "wf": normal(next(keys), (L, I, H)), "bf": jnp.zeros((L, H), jnp.float32),
        "ln1_g": jnp.ones((L, 1, H), jnp.float32),
        "ln1_b": jnp.zeros((L, 1, H), jnp.float32),
        "ln2_g": jnp.ones((L, 1, H), jnp.float32),
        "ln2_b": jnp.zeros((L, 1, H), jnp.float32),
        "cls_w": normal(next(keys), (H, NUM_LABELS)),
        "cls_b": jnp.zeros((NUM_LABELS,), jnp.float32),
    }


def prepare_kernel_params(p):
    """One-time host-side repack into the kernel layout (done OUTSIDE the jitted
    forward): head-major attention weights so the kernel needs no transposes or
    per-head lane slicing; matmul weights cast to bf16 (f32 accumulation in the
    kernel); classifier weights zero-padded to a lane-dense 128-wide slab."""
    L, H, I, NH, DH = NUM_LAYERS, HIDDEN, INTERMEDIATE, NUM_HEADS, HEAD_DIM
    bf16 = jnp.bfloat16

    def split_heads_cols(w):                       # (L, H, H) -> (L, NH, H, DH)
        return w.reshape(L, H, NH, DH).transpose(0, 2, 1, 3)

    wqkv_h = jnp.concatenate([split_heads_cols(p["wq"]),
                              split_heads_cols(p["wk"]),
                              split_heads_cols(p["wv"])], axis=-1)   # (L,NH,H,3DH)
    bqkv_h = jnp.concatenate([p["bq"].reshape(L, NH, 1, DH),
                              p["bk"].reshape(L, NH, 1, DH),
                              p["bv"].reshape(L, NH, 1, DH)], axis=-1)  # (L,NH,1,3DH)
    cls_w_pad = jnp.zeros((H, LANE), jnp.float32).at[:, :NUM_LABELS].set(p["cls_w"])
    cls_b_pad = jnp.zeros((1, LANE), jnp.float32).at[0, :NUM_LABELS].set(p["cls_b"])

    # NOTE: biases / LN params keep a size-1 middle dim ((L,1,N)); the 8-sublane
    # padding is a few KiB at these sizes and keeps in-kernel broadcasting 2-D.
    return {
        "word_emb": p["word_emb"], "pos_emb": p["pos_emb"], "type_emb": p["type_emb"],
        "emb_ln_g": p["emb_ln_g"], "emb_ln_b": p["emb_ln_b"],
        "wqkv_h": wqkv_h.astype(bf16), "bqkv_h": bqkv_h,
        "wo_h": p["wo"].reshape(L, NH, DH, H).astype(bf16),
        "bo": p["bo"].reshape(L, 1, H),
        "wi": p["wi"].astype(bf16), "bi": p["bi"].reshape(L, 1, I),
        "wf": p["wf"].astype(bf16), "bf": p["bf"].reshape(L, 1, H),
        "ln1_g": p["ln1_g"], "ln1_b": p["ln1_b"],
        "ln2_g": p["ln2_g"], "ln2_b": p["ln2_b"],
        "cls_w_pad": cls_w_pad.astype(bf16), "cls_b_pad": cls_b_pad,
    }


# ------------------------------ forward pass --------------------------------

def bert_classifier_forward(kp, input_ids, attention_mask, token_type_ids):
    B, S = input_ids.shape
    H, L = HIDDEN, NUM_LAYERS

    # Embedding lookups kept as plain-JAX glue (gather).
    pos_ids = jnp.arange(S)[None, :]
    emb = (jnp.take(kp["word_emb"], input_ids, axis=0)
           + jnp.take(kp["pos_emb"], pos_ids, axis=0)
           + jnp.take(kp["type_emb"], token_type_ids, axis=0))        # (B, S, H) f32

    # Additive attention mask, HF-style: (1 - mask) * -10000, shape (B, 1, S)
    ext_mask = (1.0 - attention_mask.astype(jnp.float32))[:, None, :] * -10000.0

    def full_spec(a):                 # whole array resident, constant block index
        zeros = (0,) * a.ndim
        return pl.BlockSpec(a.shape, lambda b, l: zeros)

    def layer_spec(a):                # stream one layer's weights per inner step
        tail_zeros = (0,) * (a.ndim - 1)
        return pl.BlockSpec((1,) + tuple(a.shape[1:]),
                            lambda b, l: (l,) + tail_zeros)

    in_specs = [
        pl.BlockSpec((1, S, H), lambda b, l: (b, 0, 0)),      # embeddings (per batch)
        pl.BlockSpec((1, 1, S), lambda b, l: (b, 0, 0)),      # additive mask
        full_spec(kp["emb_ln_g"]), full_spec(kp["emb_ln_b"]),
        layer_spec(kp["wqkv_h"]), layer_spec(kp["bqkv_h"]),
        layer_spec(kp["wo_h"]), layer_spec(kp["bo"]),
        layer_spec(kp["wi"]), layer_spec(kp["bi"]),
        layer_spec(kp["wf"]), layer_spec(kp["bf"]),
        layer_spec(kp["ln1_g"]), layer_spec(kp["ln1_b"]),
        layer_spec(kp["ln2_g"]), layer_spec(kp["ln2_b"]),
        full_spec(kp["cls_w_pad"]), full_spec(kp["cls_b_pad"]),
    ]

    kernel = functools.partial(
        _bert_layer_kernel,
        seq=S, hidden=H, num_heads=NUM_HEADS, eps=LN_EPS,
    )

    logits_pad = pl.pallas_call(
        kernel,
        out_shape=jax.ShapeDtypeStruct((B, 1, LANE), jnp.float32),
        grid=(B, L),                                           # batch outer, layer inner
        in_specs=in_specs,
        out_specs=pl.BlockSpec((1, 1, LANE), lambda b, l: (b, 0, 0)),
        scratch_shapes=[pltpu.VMEM((S, H), jnp.float32)],      # activation carry
        compiler_params=pltpu.CompilerParams(
            dimension_semantics=("parallel", "arbitrary")),    # v7x: shard batch across TCs
    )(emb, ext_mask,
      kp["emb_ln_g"], kp["emb_ln_b"],
      kp["wqkv_h"], kp["bqkv_h"], kp["wo_h"], kp["bo"],
      kp["wi"], kp["bi"], kp["wf"], kp["bf"],
      kp["ln1_g"], kp["ln1_b"], kp["ln2_g"], kp["ln2_b"],
      kp["cls_w_pad"], kp["cls_b_pad"])

    logits = logits_pad[:, 0, :NUM_LABELS]
    return (logits,)   # matches (logits,) + outputs[2:] with default BERT config


# ---------------------------------- main ------------------------------------

if __name__ == "__main__":
    key = jax.random.PRNGKey(0)
    pkey, ikey = jax.random.split(key)

    params = init_params(pkey)
    kparams = prepare_kernel_params(params)   # one-time repack, outside the jitted forward

    B, S = 2, 8
    input_ids = jax.random.randint(ikey, (B, S), 0, VOCAB, dtype=jnp.int32)
    attention_mask = jnp.ones((B, S), dtype=jnp.int32)
    token_type_ids = jnp.zeros((B, S), dtype=jnp.int32)

    fwd = jax.jit(bert_classifier_forward)
    (logits,) = fwd(kparams, input_ids, attention_mask, token_type_ids)
    logits = jax.block_until_ready(logits)
    assert logits.shape == (B, NUM_LABELS)
    print("KERNEL_OK")
</pallas_src>

<mosaic_0001>
module attributes {stable_mosaic.version = 11 : i64} {
  func.func @_bert_layer_kernel(%arg0: i32, %arg1: i32, %arg2: memref<1x8x32xf32, #tpu.memory_space<vmem>>, %arg3: memref<1x1x8xf32, #tpu.memory_space<vmem>>, %arg4: memref<1x32xf32, #tpu.memory_space<vmem>>, %arg5: memref<1x32xf32, #tpu.memory_space<vmem>>, %arg6: memref<1x4x32x24xbf16, #tpu.memory_space<vmem>>, %arg7: memref<1x4x1x24xf32, #tpu.memory_space<vmem>>, %arg8: memref<1x4x8x32xbf16, #tpu.memory_space<vmem>>, %arg9: memref<1x1x32xf32, #tpu.memory_space<vmem>>, %arg10: memref<1x32x64xbf16, #tpu.memory_space<vmem>>, %arg11: memref<1x1x64xf32, #tpu.memory_space<vmem>>, %arg12: memref<1x64x32xbf16, #tpu.memory_space<vmem>>, %arg13: memref<1x1x32xf32, #tpu.memory_space<vmem>>, %arg14: memref<1x1x32xf32, #tpu.memory_space<vmem>>, %arg15: memref<1x1x32xf32, #tpu.memory_space<vmem>>, %arg16: memref<1x1x32xf32, #tpu.memory_space<vmem>>, %arg17: memref<1x1x32xf32, #tpu.memory_space<vmem>>, %arg18: memref<32x128xbf16, #tpu.memory_space<vmem>>, %arg19: memref<1x128xf32, #tpu.memory_space<vmem>>, %arg20: memref<1x1x128xf32, #tpu.memory_space<vmem>>, %arg21: memref<8x32xf32, #tpu.memory_space<vmem>>) attributes {dimension_semantics = [#tpu.dimension_semantics<parallel>, #tpu.dimension_semantics<arbitrary>], iteration_bounds = array<i64: 2, 2>, scalar_prefetch = 0 : i64, scratch_operands = 1 : i64, tpu.core_type = #tpu.core_type<tc>, window_params = [{transform_indices = @transform_0, window_bounds = array<i64: 1, 8, 32>}, {transform_indices = @transform_1, window_bounds = array<i64: 1, 1, 8>}, {pipeline_mode = #tpu.pipeline_mode<synchronous>, transform_indices = @transform_2, window_bounds = array<i64: 1, 32>}, {pipeline_mode = #tpu.pipeline_mode<synchronous>, transform_indices = @transform_3, window_bounds = array<i64: 1, 32>}, {transform_indices = @transform_4, window_bounds = array<i64: 1, 4, 32, 24>}, {transform_indices = @transform_5, window_bounds = array<i64: 1, 4, 1, 24>}, {transform_indices = @transform_6, window_bounds = array<i64: 1, 4, 8, 32>}, {transform_indices = @transform_7, window_bounds = array<i64: 1, 1, 32>}, {transform_indices = @transform_8, window_bounds = array<i64: 1, 32, 64>}, {transform_indices = @transform_9, window_bounds = array<i64: 1, 1, 64>}, {transform_indices = @transform_10, window_bounds = array<i64: 1, 64, 32>}, {transform_indices = @transform_11, window_bounds = array<i64: 1, 1, 32>}, {transform_indices = @transform_12, window_bounds = array<i64: 1, 1, 32>}, {transform_indices = @transform_13, window_bounds = array<i64: 1, 1, 32>}, {transform_indices = @transform_14, window_bounds = array<i64: 1, 1, 32>}, {transform_indices = @transform_15, window_bounds = array<i64: 1, 1, 32>}, {pipeline_mode = #tpu.pipeline_mode<synchronous>, transform_indices = @transform_16, window_bounds = array<i64: 32, 128>}, {pipeline_mode = #tpu.pipeline_mode<synchronous>, transform_indices = @transform_17, window_bounds = array<i64: 1, 128>}, {transform_indices = @transform_18, window_bounds = array<i64: 1, 1, 128>}]} {
    %c0_i32 = arith.constant 0 : i32
    %0 = arith.cmpi eq, %arg1, %c0_i32 : i32
    %1 = arith.extui %0 : i1 to i32
    %c0_i32_0 = arith.constant 0 : i32
    %2 = arith.cmpi ne, %1, %c0_i32_0 : i32
    scf.if %2 {
      %c0_70 = arith.constant 0 : index
      %c0_71 = arith.constant 0 : index
      %c0_72 = arith.constant 0 : index
      %130 = vector.load %arg2[%c0_70, %c0_71, %c0_72] : memref<1x8x32xf32, #tpu.memory_space<vmem>>, vector<1x8x32xf32>
      %131 = vector.shape_cast %130 : vector<1x8x32xf32> to vector<8x32xf32>
      %c0_73 = arith.constant 0 : index
      %c0_74 = arith.constant 0 : index
      %132 = vector.load %arg4[%c0_73, %c0_74] : memref<1x32xf32, #tpu.memory_space<vmem>>, vector<1x32xf32>
      %c0_75 = arith.constant 0 : index
      %c0_76 = arith.constant 0 : index
      %133 = vector.load %arg5[%c0_75, %c0_76] : memref<1x32xf32, #tpu.memory_space<vmem>>, vector<1x32xf32>
      %cst_77 = arith.constant dense<0.000000e+00> : vector<8xf32>
      %134 = vector.multi_reduction <add>, %131, %cst_77 [1] : vector<8x32xf32> to vector<8xf32>
      %135 = vector.shape_cast %134 : vector<8xf32> to vector<8x1xf32>
      %cst_78 = arith.constant 3.200000e+01 : f32
      %136 = vector.broadcast %cst_78 : f32 to vector<8x1xf32>
      %137 = arith.divf %135, %136 : vector<8x1xf32>
      %138 = vector.broadcast %137 : vector<8x1xf32> to vector<8x32xf32>
      %139 = arith.subf %131, %138 : vector<8x32xf32>
      %140 = arith.mulf %139, %139 : vector<8x32xf32>
      %cst_79 = arith.constant dense<0.000000e+00> : vector<8xf32>
      %141 = vector.multi_reduction <add>, %140, %cst_79 [1] : vector<8x32xf32> to vector<8xf32>
      %142 = vector.shape_cast %141 : vector<8xf32> to vector<8x1xf32>
      %cst_80 = arith.constant 3.200000e+01 : f32
      %143 = vector.broadcast %cst_80 : f32 to vector<8x1xf32>
      %144 = arith.divf %142, %143 : vector<8x1xf32>
      %cst_81 = arith.constant 9.99999996E-13 : f32
      %145 = vector.broadcast %cst_81 : f32 to vector<8x1xf32>
      %146 = arith.addf %144, %145 : vector<8x1xf32>
      %147 = math.rsqrt %146 : vector<8x1xf32>
      %148 = vector.broadcast %147 : vector<8x1xf32> to vector<8x32xf32>
      %149 = arith.mulf %139, %148 : vector<8x32xf32>
      %150 = vector.broadcast %132 : vector<1x32xf32> to vector<8x32xf32>
      %151 = arith.mulf %149, %150 : vector<8x32xf32>
      %152 = vector.broadcast %133 : vector<1x32xf32> to vector<8x32xf32>
      %153 = arith.addf %151, %152 : vector<8x32xf32>
      %c0_82 = arith.constant 0 : index
      %c0_83 = arith.constant 0 : index
      %154 = vector.load %arg21[%c0_82, %c0_83] : memref<8x32xf32, #tpu.memory_space<vmem>>, vector<8x32xf32>
      tpu.vector_store %arg21[%c0_82, %c0_83], %153 {strides = array<i32>} : memref<8x32xf32, #tpu.memory_space<vmem>>, vector<8x32xf32>,
    } else {
    }
    %c0 = arith.constant 0 : index
    %c0_1 = arith.constant 0 : index
    %3 = vector.load %arg21[%c0, %c0_1] : memref<8x32xf32, #tpu.memory_space<vmem>>, vector<8x32xf32>
    %c0_2 = arith.constant 0 : index
    %c0_3 = arith.constant 0 : index
    %c0_4 = arith.constant 0 : index
    %4 = vector.load %arg3[%c0_2, %c0_3, %c0_4] : memref<1x1x8xf32, #tpu.memory_space<vmem>>, vector<1x1x8xf32>
    %5 = arith.truncf %3 : vector<8x32xf32> to vector<8x32xbf16>
    %6 = vector.shape_cast %5 : vector<8x32xbf16> to vector<1x8x32xbf16>
    %7 = vector.broadcast %6 : vector<1x8x32xbf16> to vector<4x8x32xbf16>
    %c0_5 = arith.constant 0 : index
    %c0_6 = arith.constant 0 : index
    %c0_7 = arith.constant 0 : index
    %c0_8 = arith.constant 0 : index
    %8 = vector.load %arg6[%c0_5, %c0_6, %c0_7, %c0_8] : memref<1x4x32x24xbf16, #tpu.memory_space<vmem>>, vector<1x4x32x24xbf16>
    %9 = vector.shape_cast %8 : vector<1x4x32x24xbf16> to vector<4x32x24xbf16>
    "tpu.trace_start"() <{level = 10 : i32, message = "hsk,hkd->hsd"}> : () -> ()
    %cst = arith.constant dense<0.000000e+00> : vector<4x8x24xf32>
    %10 = tpu.matmul %7, %9, %cst {dimension_numbers = #tpu.dot_dimension_numbers<[2], [1], [1], [2], [0, 0, 0, 1, 1, 2], [0], [0]>} : vector<4x8x32xbf16>, vector<4x32x24xbf16>, vector<4x8x24xf32> -> vector<4x8x24xf32>
    "tpu.trace_stop"() : () -> ()
    %c0_9 = arith.constant 0 : index
    %c0_10 = arith.constant 0 : index
    %c0_11 = arith.constant 0 : index
    %c0_12 = arith.constant 0 : index
    %11 = vector.load %arg7[%c0_9, %c0_10, %c0_11, %c0_12] : memref<1x4x1x24xf32, #tpu.memory_space<vmem>>, vector<1x4x1x24xf32>
    %12 = vector.shape_cast %11 : vector<1x4x1x24xf32> to vector<4x1x24xf32>
    %13 = vector.broadcast %12 : vector<4x1x24xf32> to vector<4x8x24xf32>
    %14 = arith.addf %10, %13 : vector<4x8x24xf32>
    %15 = vector.extract_strided_slice %14 {offsets = [0, 0, 0], sizes = [4, 8, 8], strides = [1, 1, 1]} : vector<4x8x24xf32> to vector<4x8x8xf32>
    %16 = vector.extract_strided_slice %14 {offsets = [0, 0, 8], sizes = [4, 8, 8], strides = [1, 1, 1]} : vector<4x8x24xf32> to vector<4x8x8xf32>
    %17 = vector.extract_strided_slice %14 {offsets = [0, 0, 16], sizes = [4, 8, 8], strides = [1, 1, 1]} : vector<4x8x24xf32> to vector<4x8x8xf32>
    %18 = arith.truncf %15 : vector<4x8x8xf32> to vector<4x8x8xbf16>
    %19 = arith.truncf %16 : vector<4x8x8xf32> to vector<4x8x8xbf16>
    "tpu.trace_start"() <{level = 10 : i32, message = "hqd,hkd->hqk"}> : () -> ()
    %cst_13 = arith.constant dense<0.000000e+00> : vector<4x8x8xf32>
    %20 = tpu.matmul %18, %19, %cst_13 {dimension_numbers = #tpu.dot_dimension_numbers<[2], [2], [1], [1], [0, 0, 0, 1, 1, 1], [0], [0]>} : vector<4x8x8xbf16>, vector<4x8x8xbf16>, vector<4x8x8xf32> -> vector<4x8x8xf32>
    "tpu.trace_stop"() : () -> ()
    %cst_14 = arith.constant 0.353553385 : f32
    %21 = vector.broadcast %cst_14 : f32 to vector<4x8x8xf32>
    %22 = arith.mulf %20, %21 : vector<4x8x8xf32>
    %23 = vector.broadcast %4 : vector<1x1x8xf32> to vector<4x8x8xf32>
    %24 = arith.addf %22, %23 : vector<4x8x8xf32>
    %cst_15 = arith.constant dense<0xFF800000> : vector<4x8xf32>
    %25 = vector.multi_reduction <maximumf>, %24, %cst_15 [2] : vector<4x8x8xf32> to vector<4x8xf32>
    %26 = vector.shape_cast %25 : vector<4x8xf32> to vector<4x8x1xf32>
    %27 = vector.broadcast %26 : vector<4x8x1xf32> to vector<4x8x8xf32>
    %28 = arith.subf %24, %27 : vector<4x8x8xf32>
    %29 = math.exp %28 : vector<4x8x8xf32>
    %cst_16 = arith.constant dense<0.000000e+00> : vector<4x8xf32>
    %30 = vector.multi_reduction <add>, %29, %cst_16 [2] : vector<4x8x8xf32> to vector<4x8xf32>
    %31 = vector.shape_cast %30 : vector<4x8xf32> to vector<4x8x1xf32>
    %32 = tpu.reciprocal %31 {approx = true} : vector<4x8x1xf32> -> vector<4x8x1xf32>
    %33 = vector.broadcast %32 : vector<4x8x1xf32> to vector<4x8x8xf32>
    %34 = arith.mulf %29, %33 : vector<4x8x8xf32>
    %35 = arith.truncf %34 : vector<4x8x8xf32> to vector<4x8x8xbf16>
    %36 = arith.truncf %17 : vector<4x8x8xf32> to vector<4x8x8xbf16>
    "tpu.trace_start"() <{level = 10 : i32, message = "hqk,hkd->hqd"}> : () -> ()
    %cst_17 = arith.constant dense<0.000000e+00> : vector<4x8x8xf32>
    %37 = tpu.matmul %35, %36, %cst_17 {dimension_numbers = #tpu.dot_dimension_numbers<[2], [1], [1], [2], [0, 0, 0, 1, 1, 2], [0], [0]>} : vector<4x8x8xbf16>, vector<4x8x8xbf16>, vector<4x8x8xf32> -> vector<4x8x8xf32>
    "tpu.trace_stop"() : () -> ()
    %38 = arith.truncf %37 : vector<4x8x8xf32> to vector<4x8x8xbf16>
    %c0_18 = arith.constant 0 : index
    %c0_19 = arith.constant 0 : index
    %c0_20 = arith.constant 0 : index
    %c0_21 = arith.constant 0 : index
    %39 = vector.load %arg8[%c0_18, %c0_19, %c0_20, %c0_21] : memref<1x4x8x32xbf16, #tpu.memory_space<vmem>>, vector<1x4x8x32xbf16>
    %40 = vector.shape_cast %39 : vector<1x4x8x32xbf16> to vector<4x8x32xbf16>
    "tpu.trace_start"() <{level = 10 : i32, message = "hqd,hdo->hqo"}> : () -> ()
    %cst_22 = arith.constant dense<0.000000e+00> : vector<4x8x32xf32>
    %41 = tpu.matmul %38, %40, %cst_22 {dimension_numbers = #tpu.dot_dimension_numbers<[2], [1], [1], [2], [0, 0, 0, 1, 1, 2], [0], [0]>} : vector<4x8x8xbf16>, vector<4x8x32xbf16>, vector<4x8x32xf32> -> vector<4x8x32xf32>
    "tpu.trace_stop"() : () -> ()
    %cst_23 = arith.constant dense<0.000000e+00> : vector<8x32xf32>
    %42 = vector.multi_reduction <add>, %41, %cst_23 [0] : vector<4x8x32xf32> to vector<8x32xf32>
    %c0_24 = arith.constant 0 : index
    %c0_25 = arith.constant 0 : index
    %c0_26 = arith.constant 0 : index
    %43 = vector.load %arg9[%c0_24, %c0_25, %c0_26] : memref<1x1x32xf32, #tpu.memory_space<vmem>>, vector<1x1x32xf32>
    %44 = vector.shape_cast %43 : vector<1x1x32xf32> to vector<1x32xf32>
    %45 = vector.broadcast %44 : vector<1x32xf32> to vector<8x32xf32>
    %46 = arith.addf %42, %45 : vector<8x32xf32>
    %47 = arith.addf %3, %46 : vector<8x32xf32>
    %c0_27 = arith.constant 0 : index
    %c0_28 = arith.constant 0 : index
    %c0_29 = arith.constant 0 : index
    %48 = vector.load %arg14[%c0_27, %c0_28, %c0_29] : memref<1x1x32xf32, #tpu.memory_space<vmem>>, vector<1x1x32xf32>
    %49 = vector.shape_cast %48 : vector<1x1x32xf32> to vector<1x32xf32>
    %c0_30 = arith.constant 0 : index
    %c0_31 = arith.constant 0 : index
    %c0_32 = arith.constant 0 : index
    %50 = vector.load %arg15[%c0_30, %c0_31, %c0_32] : memref<1x1x32xf32, #tpu.memory_space<vmem>>, vector<1x1x32xf32>
    %51 = vector.shape_cast %50 : vector<1x1x32xf32> to vector<1x32xf32>
    %cst_33 = arith.constant dense<0.000000e+00> : vector<8xf32>
    %52 = vector.multi_reduction <add>, %47, %cst_33 [1] : vector<8x32xf32> to vector<8xf32>
    %53 = vector.shape_cast %52 : vector<8xf32> to vector<8x1xf32>
    %cst_34 = arith.constant 3.200000e+01 : f32
    %54 = vector.broadcast %cst_34 : f32 to vector<8x1xf32>
    %55 = arith.divf %53, %54 : vector<8x1xf32>
    %56 = vector.broadcast %55 : vector<8x1xf32> to vector<8x32xf32>
    %57 = arith.subf %47, %56 : vector<8x32xf32>
    %58 = arith.mulf %57, %57 : vector<8x32xf32>
    %cst_35 = arith.constant dense<0.000000e+00> : vector<8xf32>
    %59 = vector.multi_reduction <add>, %58, %cst_35 [1] : vector<8x32xf32> to vector<8xf32>
    %60 = vector.shape_cast %59 : vector<8xf32> to vector<8x1xf32>
    %cst_36 = arith.constant 3.200000e+01 : f32
    %61 = vector.broadcast %cst_36 : f32 to vector<8x1xf32>
    %62 = arith.divf %60, %61 : vector<8x1xf32>
    %cst_37 = arith.constant 9.99999996E-13 : f32
    %63 = vector.broadcast %cst_37 : f32 to vector<8x1xf32>
    %64 = arith.addf %62, %63 : vector<8x1xf32>
    %65 = math.rsqrt %64 : vector<8x1xf32>
    %66 = vector.broadcast %65 : vector<8x1xf32> to vector<8x32xf32>
    %67 = arith.mulf %57, %66 : vector<8x32xf32>
    %68 = vector.broadcast %49 : vector<1x32xf32> to vector<8x32xf32>
    %69 = arith.mulf %67, %68 : vector<8x32xf32>
    %70 = vector.broadcast %51 : vector<1x32xf32> to vector<8x32xf32>
    %71 = arith.addf %69, %70 : vector<8x32xf32>
    %72 = arith.truncf %71 : vector<8x32xf32> to vector<8x32xbf16>
    %c0_38 = arith.constant 0 : index
    %c0_39 = arith.constant 0 : index
    %c0_40 = arith.constant 0 : index
    %73 = vector.load %arg10[%c0_38, %c0_39, %c0_40] : memref<1x32x64xbf16, #tpu.memory_space<vmem>>, vector<1x32x64xbf16>
    %74 = vector.shape_cast %73 : vector<1x32x64xbf16> to vector<32x64xbf16>
    %cst_41 = arith.constant dense<0.000000e+00> : vector<8x64xf32>
    %75 = tpu.matmul %72, %74, %cst_41 {dimension_numbers = #tpu.dot_dimension_numbers<[1], [0], [0], [1], [0, 0, 1, 1], [], []>} : vector<8x32xbf16>, vector<32x64xbf16>, vector<8x64xf32> -> vector<8x64xf32>
    %c0_42 = arith.constant 0 : index
    %c0_43 = arith.constant 0 : index
    %c0_44 = arith.constant 0 : index
    %76 = vector.load %arg11[%c0_42, %c0_43, %c0_44] : memref<1x1x64xf32, #tpu.memory_space<vmem>>, vector<1x1x64xf32>
    %77 = vector.shape_cast %76 : vector<1x1x64xf32> to vector<1x64xf32>
    %78 = vector.broadcast %77 : vector<1x64xf32> to vector<8x64xf32>
    %79 = arith.addf %75, %78 : vector<8x64xf32>
    %80 = arith.mulf %79, %79 : vector<8x64xf32>
    %81 = arith.mulf %79, %80 : vector<8x64xf32>
    %cst_45 = arith.constant 4.471500e-02 : f32
    %82 = vector.broadcast %cst_45 : f32 to vector<8x64xf32>
    %83 = arith.mulf %82, %81 : vector<8x64xf32>
    %84 = arith.addf %79, %83 : vector<8x64xf32>
    %cst_46 = arith.constant 0.797884583 : f32
    %85 = vector.broadcast %cst_46 : f32 to vector<8x64xf32>
    %86 = arith.mulf %85, %84 : vector<8x64xf32>
    %87 = math.tanh %86 : vector<8x64xf32>
    %cst_47 = arith.constant 1.000000e+00 : f32
    %88 = vector.broadcast %cst_47 : f32 to vector<8x64xf32>
    %89 = arith.addf %88, %87 : vector<8x64xf32>
    %cst_48 = arith.constant 5.000000e-01 : f32
    %90 = vector.broadcast %cst_48 : f32 to vector<8x64xf32>
    %91 = arith.mulf %90, %89 : vector<8x64xf32>
    %92 = arith.mulf %79, %91 : vector<8x64xf32>
    %93 = arith.truncf %92 : vector<8x64xf32> to vector<8x64xbf16>
    %c0_49 = arith.constant 0 : index
    %c0_50 = arith.constant 0 : index
    %c0_51 = arith.constant 0 : index
    %94 = vector.load %arg12[%c0_49, %c0_50, %c0_51] : memref<1x64x32xbf16, #tpu.memory_space<vmem>>, vector<1x64x32xbf16>
    %95 = vector.shape_cast %94 : vector<1x64x32xbf16> to vector<64x32xbf16>
    %cst_52 = arith.constant dense<0.000000e+00> : vector<8x32xf32>
    %96 = tpu.matmul %93, %95, %cst_52 {dimension_numbers = #tpu.dot_dimension_numbers<[1], [0], [0], [1], [0, 0, 1, 1], [], []>} : vector<8x64xbf16>, vector<64x32xbf16>, vector<8x32xf32> -> vector<8x32xf32>
    %c0_53 = arith.constant 0 : index
    %c0_54 = arith.constant 0 : index
    %c0_55 = arith.constant 0 : index
    %97 = vector.load %arg13[%c0_53, %c0_54, %c0_55] : memref<1x1x32xf32, #tpu.memory_space<vmem>>, vector<1x1x32xf32>
    %98 = vector.shape_cast %97 : vector<1x1x32xf32> to vector<1x32xf32>
    %99 = vector.broadcast %98 : vector<1x32xf32> to vector<8x32xf32>
    %100 = arith.addf %96, %99 : vector<8x32xf32>
    %101 = arith.addf %71, %100 : vector<8x32xf32>
    %c0_56 = arith.constant 0 : index
    %c0_57 = arith.constant 0 : index
    %c0_58 = arith.constant 0 : index
    %102 = vector.load %arg16[%c0_56, %c0_57, %c0_58] : memref<1x1x32xf32, #tpu.memory_space<vmem>>, vector<1x1x32xf32>
    %103 = vector.shape_cast %102 : vector<1x1x32xf32> to vector<1x32xf32>
    %c0_59 = arith.constant 0 : index
    %c0_60 = arith.constant 0 : index
    %c0_61 = arith.constant 0 : index
    %104 = vector.load %arg17[%c0_59, %c0_60, %c0_61] : memref<1x1x32xf32, #tpu.memory_space<vmem>>, vector<1x1x32xf32>
    %105 = vector.shape_cast %104 : vector<1x1x32xf32> to vector<1x32xf32>
    %cst_62 = arith.constant dense<0.000000e+00> : vector<8xf32>
    %106 = vector.multi_reduction <add>, %101, %cst_62 [1] : vector<8x32xf32> to vector<8xf32>
    %107 = vector.shape_cast %106 : vector<8xf32> to vector<8x1xf32>
    %cst_63 = arith.constant 3.200000e+01 : f32
    %108 = vector.broadcast %cst_63 : f32 to vector<8x1xf32>
    %109 = arith.divf %107, %108 : vector<8x1xf32>
    %110 = vector.broadcast %109 : vector<8x1xf32> to vector<8x32xf32>
    %111 = arith.subf %101, %110 : vector<8x32xf32>
    %112 = arith.mulf %111, %111 : vector<8x32xf32>
    %cst_64 = arith.constant dense<0.000000e+00> : vector<8xf32>
    %113 = vector.multi_reduction <add>, %112, %cst_64 [1] : vector<8x32xf32> to vector<8xf32>
    %114 = vector.shape_cast %113 : vector<8xf32> to vector<8x1xf32>
    %cst_65 = arith.constant 3.200000e+01 : f32
    %115 = vector.broadcast %cst_65 : f32 to vector<8x1xf32>
    %116 = arith.divf %114, %115 : vector<8x1xf32>
    %cst_66 = arith.constant 9.99999996E-13 : f32
    %117 = vector.broadcast %cst_66 : f32 to vector<8x1xf32>
    %118 = arith.addf %116, %117 : vector<8x1xf32>
    %119 = math.rsqrt %118 : vector<8x1xf32>
    %120 = vector.broadcast %119 : vector<8x1xf32> to vector<8x32xf32>
    %121 = arith.mulf %111, %120 : vector<8x32xf32>
    %122 = vector.broadcast %103 : vector<1x32xf32> to vector<8x32xf32>
    %123 = arith.mulf %121, %122 : vector<8x32xf32>
    %124 = vector.broadcast %105 : vector<1x32xf32> to vector<8x32xf32>
    %125 = arith.addf %123, %124 : vector<8x32xf32>
    %c0_67 = arith.constant 0 : index
    %c0_68 = arith.constant 0 : index
    %126 = vector.load %arg21[%c0_67, %c0_68] : memref<8x32xf32, #tpu.memory_space<vmem>>, vector<8x32xf32>
    tpu.vector_store %arg21[%c0_67, %c0_68], %125 {strides = array<i32>} : memref<8x32xf32, #tpu.memory_space<vmem>>, vector<8x32xf32>,
    %c1_i32 = arith.constant 1 : i32
    %127 = arith.cmpi eq, %arg1, %c1_i32 : i32
    %128 = arith.extui %127 : i1 to i32
    %c0_i32_69 = arith.constant 0 : i32
    %129 = arith.cmpi ne, %128, %c0_i32_69 : i32
    scf.if %129 {
      %cst_70 = arith.constant dense<0.000000e+00> : vector<32xf32>
      %130 = vector.multi_reduction <add>, %125, %cst_70 [0] : vector<8x32xf32> to vector<32xf32>
      %131 = vector.shape_cast %130 : vector<32xf32> to vector<1x32xf32>
      %cst_71 = arith.constant 8.000000e+00 : f32
      %132 = vector.broadcast %cst_71 : f32 to vector<1x32xf32>
      %133 = arith.divf %131, %132 : vector<1x32xf32>
      %134 = arith.truncf %133 : vector<1x32xf32> to vector<1x32xbf16>
      %c0_72 = arith.constant 0 : index
      %c0_73 = arith.constant 0 : index
      %135 = vector.load %arg18[%c0_72, %c0_73] : memref<32x128xbf16, #tpu.memory_space<vmem>>, vector<32x128xbf16>
      %cst_74 = arith.constant dense<0.000000e+00> : vector<1x128xf32>
      %136 = tpu.matmul %134, %135, %cst_74 {dimension_numbers = #tpu.dot_dimension_numbers<[1], [0], [0], [1], [0, 0, 1, 1], [], []>} : vector<1x32xbf16>, vector<32x128xbf16>, vector<1x128xf32> -> vector<1x128xf32>
      %c0_75 = arith.constant 0 : index
      %c0_76 = arith.constant 0 : index
      %137 = vector.load %arg19[%c0_75, %c0_76] : memref<1x128xf32, #tpu.memory_space<vmem>>, vector<1x128xf32>
      %138 = arith.addf %136, %137 : vector<1x128xf32>
      %c0_77 = arith.constant 0 : index
      %c0_78 = arith.constant 0 : index
      %c0_79 = arith.constant 0 : index
      %139 = vector.load %arg20[%c0_77, %c0_78, %c0_79] : memref<1x1x128xf32, #tpu.memory_space<vmem>>, vector<1x1x128xf32>
      %140 = vector.shape_cast %139 : vector<1x1x128xf32> to vector<1x128xf32>
      %141 = vector.shape_cast %138 : vector<1x128xf32> to vector<1x1x128xf32>
      tpu.vector_store %arg20[%c0_77, %c0_78, %c0_79], %141 {strides = array<i32>} : memref<1x1x128xf32, #tpu.memory_space<vmem>>, vector<1x1x128xf32>,
    } else {
    }
    return
  }
  func.func @transform_0(%arg0: i32, %arg1: i32) -> (i32, i32, i32) {
    %c0_i32 = arith.constant 0 : i32
    %c0_i32_0 = arith.constant 0 : i32
    %c0_i32_1 = arith.constant 0 : i32
    return %arg0, %c0_i32, %c0_i32_0 : i32, i32, i32
  }
  func.func @transform_1(%arg0: i32, %arg1: i32) -> (i32, i32, i32) {
    %c0_i32 = arith.constant 0 : i32
    %c0_i32_0 = arith.constant 0 : i32
    %c0_i32_1 = arith.constant 0 : i32
    return %arg0, %c0_i32, %c0_i32_0 : i32, i32, i32
  }
  func.func @transform_2(%arg0: i32, %arg1: i32) -> (i32, i32) {
    %c0_i32 = arith.constant 0 : i32
    %c0_i32_0 = arith.constant 0 : i32
    %c0_i32_1 = arith.constant 0 : i32
    return %c0_i32, %c0_i32_0 : i32, i32
  }
  func.func @transform_3(%arg0: i32, %arg1: i32) -> (i32, i32) {
    %c0_i32 = arith.constant 0 : i32
    %c0_i32_0 = arith.constant 0 : i32
    %c0_i32_1 = arith.constant 0 : i32
    return %c0_i32, %c0_i32_0 : i32, i32
  }
  func.func @transform_4(%arg0: i32, %arg1: i32) -> (i32, i32, i32, i32) {
    %c0_i32 = arith.constant 0 : i32
    %c0_i32_0 = arith.constant 0 : i32
    %c0_i32_1 = arith.constant 0 : i32
    %c0_i32_2 = arith.constant 0 : i32
    return %arg1, %c0_i32, %c0_i32_0, %c0_i32_1 : i32, i32, i32, i32
  }
  func.func @transform_5(%arg0: i32, %arg1: i32) -> (i32, i32, i32, i32) {
    %c0_i32 = arith.constant 0 : i32
    %c0_i32_0 = arith.constant 0 : i32
    %c0_i32_1 = arith.constant 0 : i32
    %c0_i32_2 = arith.constant 0 : i32
    return %arg1, %c0_i32, %c0_i32_0, %c0_i32_1 : i32, i32, i32, i32
  }
  func.func @transform_6(%arg0: i32, %arg1: i32) -> (i32, i32, i32, i32) {
    %c0_i32 = arith.constant 0 : i32
    %c0_i32_0 = arith.constant 0 : i32
    %c0_i32_1 = arith.constant 0 : i32
    %c0_i32_2 = arith.constant 0 : i32
    return %arg1, %c0_i32, %c0_i32_0, %c0_i32_1 : i32, i32, i32, i32
  }
  func.func @transform_7(%arg0: i32, %arg1: i32) -> (i32, i32, i32) {
    %c0_i32 = arith.constant 0 : i32
    %c0_i32_0 = arith.constant 0 : i32
    %c0_i32_1 = arith.constant 0 : i32
    return %arg1, %c0_i32, %c0_i32_0 : i32, i32, i32
  }
  func.func @transform_8(%arg0: i32, %arg1: i32) -> (i32, i32, i32) {
    %c0_i32 = arith.constant 0 : i32
    %c0_i32_0 = arith.constant 0 : i32
    %c0_i32_1 = arith.constant 0 : i32
    return %arg1, %c0_i32, %c0_i32_0 : i32, i32, i32
  }
  func.func @transform_9(%arg0: i32, %arg1: i32) -> (i32, i32, i32) {
    %c0_i32 = arith.constant 0 : i32
    %c0_i32_0 = arith.constant 0 : i32
    %c0_i32_1 = arith.constant 0 : i32
    return %arg1, %c0_i32, %c0_i32_0 : i32, i32, i32
  }
  func.func @transform_10(%arg0: i32, %arg1: i32) -> (i32, i32, i32) {
    %c0_i32 = arith.constant 0 : i32
    %c0_i32_0 = arith.constant 0 : i32
    %c0_i32_1 = arith.constant 0 : i32
    return %arg1, %c0_i32, %c0_i32_0 : i32, i32, i32
  }
  func.func @transform_11(%arg0: i32, %arg1: i32) -> (i32, i32, i32) {
    %c0_i32 = arith.constant 0 : i32
    %c0_i32_0 = arith.constant 0 : i32
    %c0_i32_1 = arith.constant 0 : i32
    return %arg1, %c0_i32, %c0_i32_0 : i32, i32, i32
  }
  func.func @transform_12(%arg0: i32, %arg1: i32) -> (i32, i32, i32) {
    %c0_i32 = arith.constant 0 : i32
    %c0_i32_0 = arith.constant 0 : i32
    %c0_i32_1 = arith.constant 0 : i32
    return %arg1, %c0_i32, %c0_i32_0 : i32, i32, i32
  }
  func.func @transform_13(%arg0: i32, %arg1: i32) -> (i32, i32, i32) {
    %c0_i32 = arith.constant 0 : i32
    %c0_i32_0 = arith.constant 0 : i32
    %c0_i32_1 = arith.constant 0 : i32
    return %arg1, %c0_i32, %c0_i32_0 : i32, i32, i32
  }
  func.func @transform_14(%arg0: i32, %arg1: i32) -> (i32, i32, i32) {
    %c0_i32 = arith.constant 0 : i32
    %c0_i32_0 = arith.constant 0 : i32
    %c0_i32_1 = arith.constant 0 : i32
    return %arg1, %c0_i32, %c0_i32_0 : i32, i32, i32
  }
  func.func @transform_15(%arg0: i32, %arg1: i32) -> (i32, i32, i32) {
    %c0_i32 = arith.constant 0 : i32
    %c0_i32_0 = arith.constant 0 : i32
    %c0_i32_1 = arith.constant 0 : i32
    return %arg1, %c0_i32, %c0_i32_0 : i32, i32, i32
  }
  func.func @transform_16(%arg0: i32, %arg1: i32) -> (i32, i32) {
    %c0_i32 = arith.constant 0 : i32
    %c0_i32_0 = arith.constant 0 : i32
    %c0_i32_1 = arith.constant 0 : i32
    return %c0_i32, %c0_i32_0 : i32, i32
  }
  func.func @transform_17(%arg0: i32, %arg1: i32) -> (i32, i32) {
    %c0_i32 = arith.constant 0 : i32
    %c0_i32_0 = arith.constant 0 : i32
    %c0_i32_1 = arith.constant 0 : i32
    return %c0_i32, %c0_i32_0 : i32, i32
  }
  func.func @transform_18(%arg0: i32, %arg1: i32) -> (i32, i32, i32) {
    %c0_i32 = arith.constant 0 : i32
    %c0_i32_0 = arith.constant 0 : i32
    %c0_i32_1 = arith.constant 0 : i32
    return %arg0, %c0_i32, %c0_i32_0 : i32, i32, i32
  }
}

</mosaic_0001>

<bundles_post_ra>
// kernel: bert_classifier_forward.1
= control target key start
LH: loop header
LB: loop body
LE: loop exit
PB: predicated region body
PF: predicated region fallthrough
CT: control target
= control target key end

     0   :  { %s2537_s0 = inlined_call_operand.vmem [shape: f32[2,8,32], index: 0, kind: input, shape index: {}]   ;;  %s2538_s1 = inlined_call_operand.vmem [shape: f32[2,1,8], index: 1, kind: input, shape index: {}]   ;;  %s2539_s2 = inlined_call_operand.vmem [shape: f32[1,32], index: 2, kind: input, shape index: {}]   ;;  %s2540_s3 = inlined_call_operand.vmem [shape: f32[1,32], index: 3, kind: input, shape index: {}]   ;;  %s2541_s4 = inlined_call_operand.vmem [shape: bf16[2,4,32,24], index: 4, kind: input, shape index: {}]   ;;  %s2542_s5 = inlined_call_operand.vmem [shape: f32[2,4,1,24], index: 5, kind: input, shape index: {}]   ;;  %s2543_s6 = inlined_call_operand.vmem [shape: bf16[2,4,8,32], index: 6, kind: input, shape index: {}]   ;;  %s2544_s7 = inlined_call_operand.vmem [shape: f32[2,1,32], index: 7, kind: input, shape index: {}]   ;;  %s2545_s8 = inlined_call_operand.vmem [shape: bf16[2,32,64], index: 8, kind: input, shape index: {}]   ;;  %s2546_s9 = inlined_call_operand.vmem [shape: f32[2,1,64], index: 9, kind: input, shape index: {}]   ;;  %s2547_s10 = inlined_call_operand.vmem [shape: bf16[2,64,32], index: 10, kind: input, shape index: {}]   ;;  %s2548_s11 = inlined_call_operand.vmem [shape: f32[2,1,32], index: 11, kind: input, shape index: {}]   ;;  %s2549_s12 = inlined_call_operand.vmem [shape: f32[2,1,32], index: 12, kind: input, shape index: {}]   ;;  %s2550_s13 = inlined_call_operand.vmem [shape: f32[2,1,32], index: 13, kind: input, shape index: {}]   ;;  %s2551_s14 = inlined_call_operand.vmem [shape: f32[2,1,32], index: 14, kind: input, shape index: {}]   ;;  %s2552_s15 = inlined_call_operand.vmem [shape: f32[2,1,32], index: 15, kind: input, shape index: {}]   ;;  %s2553_s16 = inlined_call_operand.vmem [shape: bf16[32,128], index: 16, kind: input, shape index: {}]   ;;  %s2554_s17 = inlined_call_operand.vmem [shape: f32[1,128], index: 17, kind: input, shape index: {}]   ;;  %s2555_s18 = inlined_call_operand.hbm [shape: f32[2,1,128], index: 18, kind: output, shape index: {}]  }
   0x1   :  { %2572 = sst [smem:[#allocation20_spill]] %s2537_s0 }
   0x2   :  { %2573 = sst [smem:[#allocation21_spill]] %s2538_s1 }
   0x3   :  { %2574 = sst [smem:[#allocation22_spill]] %s2539_s2 }
   0x4   :  { %2575 = sst [smem:[#allocation23_spill]] %s2540_s3 }
   0x5   :  { %2576 = sst [smem:[#allocation24_spill]] %s2541_s4 }
   0x6   :  { %2577 = sst [smem:[#allocation25_spill]] %s2542_s5 }
   0x7   :  { %2578 = sst [smem:[#allocation26_spill]] %s2543_s6 }
   0x8   :  { %2579 = sst [smem:[#allocation27_spill]] %s2545_s8 }
   0x9   :  { %2580 = sst [smem:[#allocation28_spill]] %s2553_s16 }
   0xa   :  { %2581 = sst [smem:[#allocation29_spill]] %s2554_s17 }
   0xb   :  { %2582 = sst [smem:[#allocation30_spill]] %s2555_s18 }
   0xc   :  { %23 = vsyncpa [#allocation4], 0 }
   0xd   :  { %25 = vsyncpa [#allocation4 + $0x1], 0  ;;  %s2195_s27 = smov 0   ;;  %s2197_s28 = smov 0  }
   0xe   :  { %s2199_s29 = smov 0   ;;  %s2201_s30 = smov 0  }
   0xf   :  { %s2203_s0 = smov 0   ;;  %s2205_s19 = smov 0  }
  0x10   :  { %s2207_s1 = smov 0   ;;  %s2209_s20 = smov 0  }
  0x11 LB: > { %2583 = sst [smem:[#allocation6_spill]] %s2065_s27  ;;  %s1757_s21 = sadd.s32 4294967295, %s2093_s20   ;;  %s2093_s20 = sphi %s2209_s20, %s31_s20   ;;  %s2089_s1 = sphi %s2207_s1, %s2632_s1   ;;  %s2085_s19 = sphi %s2205_s19, %s2631_s19   ;;  %s2081_s0 = sphi %s2203_s0, %s2630_s0   ;;  %s2077_s30 = sphi %s2201_s30, %s2629_s30   ;;  %s2073_s29 = sphi %s2199_s29, %s2628_s29   ;;  %s2069_s28 = sphi %s2197_s28, %s2634_s28   ;;  %s2065_s27 = sphi %s2195_s27, %s2633_s27  }
  0x12   : > { %2584 = sst [smem:[#allocation7_spill]] %s2073_s29  ;;  %s1758_s22 = sadd.s32 4294967294, %s2093_s20  }
  0x13   : > { %2585 = sst [smem:[#allocation8_spill]] %s2077_s30  ;;  %s40_s2 = sadd.s32 1, %s2085_s19 }
  0x14   : > { %2586 = sst [smem:[#allocation9_spill]] %s2081_s0  ;;  %p41_p0 = scmp.ge.s32.totalorder %s40_s2, 2 }
  0x15   : > { %2587 = sst [smem:[#allocation10_spill]] %s2085_s19  ;;  %s43_s23 = sadd.s32 1, %s2089_s1 }
  0x16   : > { %2588 = sst [smem:[#allocation11_spill]] %s2089_s1  ;;  %p508_p1 = scmp.ne.s32.totalorder %s2073_s29, %s2069_s28 }
  0x17   : > { %2589 = sst [smem:[#allocation12_spill]] %s2093_s20  ;;  %p509_p2 = scmp.eq.s32.totalorder %s1757_s21, 3 }
  0x18   : > { %s2636_s2 = smov (%p41_p0, %s40_s2), 0  ;;  %s2638_s23 = smov (!%p41_p0, %s43_s23), %s2089_s1 }
  0x19   : > { %2590 = sst [smem:[#allocation13_spill]] %s2636_s2  ;;  %p2244_p3 = por %p509_p2, %p508_p1 }
  0x1a   : > { %p514_p4 = scmp.ne.s32.totalorder %s2069_s28, %s2065_s27  ;;  %p45_p5 = scmp.ge.s32.totalorder %s2638_s23, 2 }
  0x1b   : > { %s2591_s24 = scalar_select %p2244_p3, 1, 0 }
  0x1c   : > { %p515_p6 = scmp.eq.s32.totalorder %s1758_s22, 3  ;;  %p1761_p7 = scmp.ge.s32.totalorder %s2093_s20, 1 }
  0x1d   : > { %2592 = sst [smem:[#allocation14_spill]] %s2591_s24  ;;  %p639_p8 = scmp.lt.s32.totalorder %s2093_s20, 5 }
  0x1e   : > { %s2640_s23 = smov (%p45_p5, %s2638_s23), 0  ;;  %p2254_p9 = por %p515_p6, %p514_p4 }
  0x1f   : > { %2593 = sst [smem:[#allocation15_spill]] %s2640_s23  ;;  %p640_p10 = pnand %p1761_p7, %p639_p8 }
  0x20   : > { %s2594_s25 = scalar_select %p2254_p9, 1, 0 }
  0x21   : > { %s495_s26 = ssub.s32 %s2089_s1, %s2640_s23  ;;  %s498_s21 = sadd.s32 1, %s2073_s29 }
  0x22   : > { %2595 = sst [smem:[#allocation16_spill]] %s2594_s25  ;;  %p496_p11 = scmp.eq.s32.totalorder %s495_s26, 0 }
  0x23   : > { %643 = sbr.rel (%p640_p10) target bundleno = 2282 (0x8ea), region = 92 }
  0x24   : > { %s2262_s2 = scalar_select %p496_p11, %s2073_s29, %s498_s21  }
  0x26   : > { %2596 = sst [smem:[#allocation17_spill]] %s2262_s2 }
  0x28   : > { %p739_p12 = scmp.lt.s32.totalorder %s2081_s0, 1  ;;  %p746_p13 = scmp.lt.s32.totalorder %s2077_s30, 1 }
  0x29   : > { %s2599_s27 = sld [smem:[#allocation20_spill]]  ;;  %s2605_s1 = sand.u32 1, %s2069_s28  }
  0x2a   : > { %s2268_s19 = scalar_select %p739_p12, %s2081_s0, 1 }
  0x2b   : > { %s2271_s25 = scalar_select %p746_p13, %s2077_s30, 1 }
  0x2c   : > { %2597 = sst [smem:[#allocation18_spill]] %s2268_s19  ;;  %s1762_s26 = sshll.u32 %s2268_s19, 3 }
  0x2d   : > { %s1859_s24 = sshll.u32 %s2271_s25, 6  ;;  %s2600_s4 = sld [smem:[#allocation24_spill]] }
  0x2e   : > { %s1765_s16 = sshll.u32 %s2271_s25, 2  ;;  %s2601_s5 = sld [smem:[#allocation25_spill]] }
  0x2f   : > { %s742_s20 = scalar_lea.vmem %s2599_s27, %s1762_s26  ;;  %s1860_s22 = sshll.u32 %s2271_s25, 4 }
  0x30   : > { %s2602_s6 = sld [smem:[#allocation26_spill]]  ;;  %s781_s18 = scalar_lea.vmem %s2549_s12, %s2271_s25 }
  0x31   : > { %s2604_s8 = sld [smem:[#allocation27_spill]]  ;;  %s784_s26 = scalar_lea.vmem %s2550_s13, %s2271_s25 }
  0x32   : > { %s787_s3 = scalar_lea.vmem %s2551_s14, %s2271_s25  ;;  %s790_s30 = scalar_lea.vmem %s2552_s15, %s2271_s25 }
  0x33   : > { %s2285_s17 = scalar_lea.vmem %s2600_s4, %s1859_s24 }
  0x34   : > { %s2291_s23 = scalar_lea.vmem %s2601_s5, %s1765_s16  ;;  %s1862_s16 = sshll.u32 %s2271_s25, 5 }
  0x36   : > { %s2297_s29 = scalar_lea.vmem %s2602_s6, %s1860_s22  ;;  %s2340_s6 = scalar_lea.vmem [#allocation3], %s2605_s1 }
  0x37   : > { %2603 = sst [smem:[#allocation19_spill]] %s2297_s29  ;;  %s2306_s24 = scalar_lea.vmem %s2604_s8, %s1860_s22 }
  0x38   : > { %s2320_s29 = scalar_lea.vmem %s2547_s10, %s1862_s16  ;;  %s2606_s16 = sld [smem:[#allocation8_spill]] }
  0x3e   : > { %p1772_p0 = scmp.ne.s32.totalorder %s2606_s16, 0 }
  0x3f   : > { %s2607_s1 = sld [smem:[#allocation22_spill]] (!%p1772_p0) }
  0x40   : > { %795 = sbr.rel (%p1772_p0) target bundleno = 339 (0x153), region = 96  ;;  %s2608_s2 = sld [smem:[#allocation23_spill]] (!%p1772_p0) }
  0x45   : > { %v796_v0 = vld [vmem:[%s742_s20] sm:$0xff]  ;;  %vm799_vm0 = vcmask 261120   ;;  %v2095_v2 = vmov 32.0  }
  0x46   : > { %v800_v1 = vsel %vm799_vm0, %v796_v0, 0.0  ;;  %1957 = vrcp.f32 %v2095_v2  ;;  %v1955_v23 = vld [vmem:[%s2607_s1] ss:$0 sm:$0xff] }
  0x47   : > { %801 = vadd.xlane.f32.xlu0 %v800_v1  ;;  %v1956_v25 = vld [vmem:[%s2608_s2] ss:$0 sm:$0xff] }
  0x4c   : > { %v1958_v3 = vpop.eup %1957 }
  0x4d   : > { %v804_v4 = vmul.f32 32.0, %v1958_v3  ;;  %vm808_vm1 = vweird.f32 %v1958_v3 }
  0x4f   : > { %v805_v5 = vsub.f32 1.0, %v804_v4 }
  0x51   : > { %v806_v6 = vmul.f32 %v1958_v3, %v805_v5 }
  0x53   : > { %v807_v7 = vadd.f32 %v1958_v3, %v806_v6 }
  0x55   : > { %v809_v8 = vsel %vm808_vm1, %v1958_v3, %v807_v7 }
  0xba   : > { %v802_v9 = vpop.xlane.xlu0 %801 }
  0xbb   : > { %v810_v10 = vmul.f32 %v809_v8, %v802_v9 }
  0xbd   : > { %v811_v11 = vsub.f32 %v796_v0, %v810_v10 }
  0xbf   : > { %v812_v12 = vmul.f32 %v811_v11, %v811_v11 }
  0xc1   : > { %v813_v13 = vsel %vm799_vm0, %v812_v12, 0.0 }
  0xc2   : > { %814 = vadd.xlane.f32.xlu0 %v813_v13 }
 0x135   : > { %v815_v14 = vpop.xlane.xlu0 %814 }
 0x136   : > { %v816_v15 = vmul.f32 %v815_v14, %v809_v8 }
 0x138   : > { %v817_v16 = vadd.f32 1e-12, %v816_v15 }
 0x13a   : > { %1959 = vrsqrt.f32 %v817_v16  ;;  %vm824_vm3 = vweird.f32 %v817_v16 }
 0x140   : > { %v1960_v17 = vpop.eup %1959 }
 0x141   : > { %v819_v18 = vmul.f32 %v1960_v17, %v817_v16  ;;  %vm825_vm2 = vweird.f32 %v1960_v17 }
 0x142   : > { %vm826_vm4 = vmor %vm824_vm3, %vm825_vm2 }
 0x143   : > { %v820_v19 = vmul.f32 %v1960_v17, %v819_v18 }
 0x145   : > { %v821_v20 = vmul.f32 0.5, %v820_v19 }
 0x147   : > { %v822_v21 = vsub.f32 1.5, %v821_v20 }
 0x149   : > { %v823_v22 = vmul.f32 %v1960_v17, %v822_v21 }
 0x14b   : > { %v827_v24 = vsel %vm826_vm4, %v1960_v17, %v823_v22 }
 0x14c   : > { %v828_v26 = vmul.f32 %v827_v24, %v811_v11 }
 0x14e   : > { %v832_v27 = vmul.f32 %v1955_v23, %v828_v26 }
 0x150   : > { %v836_v28 = vadd.f32 %v1956_v25, %v832_v27 }
 0x152   : > { %837 = vst.msk [vmem:[#allocation2] sm:$0xff] %vm799_vm0, %v836_v28 }
 0x153 PF: > { %v1864_v29 = vld [vmem:[%s2285_s17 + $0x8] sm:$0xff]  ;;  %v1870_v31 = vld [vmem:[%s2285_s17 + $0x38] sm:$0xff]  ;;  %v1863_v32 = vld [vmem:[%s2285_s17] sm:$0xff]  ;;  %vm885_vm5 = vcmask 261120   ;;  %vm986_vm6 = vcmask 64512   ;;  %s2610_s4 = sld [smem:[#allocation21_spill]]  ;;  %s2613_s1 = scalar_lea.vmem %s2544_s7, %s2271_s25 }
 0x154   : > { %v1868_v30 = vld [vmem:[%s2285_s17 + $0x28] sm:$0xff]  ;;  %v1866_v33 = vld [vmem:[%s2285_s17 + $0x18] sm:$0xff]  ;;  %895 = vmatpush.bf16.msra.mxu0 %v1864_v29  ;;  %v1867_v34 = vld [vmem:[%s2285_s17 + $0x20] sm:$0xff]  ;;  %970 = vmatpush.bf16.msra.mxu3 %v1870_v31  ;;  %s2097_s5 = smov 112   ;;  %vm1142_vm7 = vcmask 1043456   ;;  %s2612_s16 = sld [smem:[#allocation19_spill]] }
 0x155   : > { %945 = vmatpush.bf16.msra.mxu2 %v1868_v30  ;;  %v1869_v35 = vld [vmem:[%s2285_s17 + $0x30] sm:$0xff]  ;;  %920 = vmatpush.bf16.msra.mxu1 %v1866_v33  ;;  %v1961_v39 = vld [vmem:[%s2291_s23] ss:$0 sm:$0xff]  ;;  %v1962_v40 = vld [vmem:[%s2291_s23 + $0x1] ss:$0 sm:$0xff]  ;;  %vm1441_vm12 = vcmask 523264   ;;  %s2615_s22 = scalar_lea.vmem %s2548_s11, %s2271_s25 }
 0x156   : > { %v1865_v37 = vld [vmem:[%s2285_s17 + $0x10] sm:$0xff]  ;;  %v1963_v46 = vld [vmem:[%s2291_s23 + $0x2] ss:$0 sm:$0xff]  ;;  %v1964_v47 = vld [vmem:[%s2291_s23 + $0x3] ss:$0 sm:$0xff]  ;;  %s2096_s17 = smov 120  }
 0x157   : > { %s2609_s23 = sld [smem:[#allocation18_spill]] }
 0x158   : > { %896 = vmatpush.bf16.msra.mxu0 %v1863_v32  ;;  %971 = vmatpush.bf16.msra.mxu3 %v1869_v35 }
 0x159   : > { %v2359_v36 = vld [vmem:[#allocation2] sm:$0xff]  ;;  %946 = vmatpush.bf16.msra.mxu2 %v1867_v34  ;;  %921 = vmatpush.bf16.msra.mxu1 %v1865_v37 }
 0x15a   : > { %v840_v38 = vpack.c.bf16 %v2359_v36, %v2359_v36 }
 0x15c   : > { %1781 = vmatmul.msk.bf16.vlgmr.msra.gmra.mxu0 %vm885_vm5, %v840_v38  ;;  %1799 = vmatmul.msk.bf16.vlgmr.msra.gmra.mxu2 %vm885_vm5, %v840_v38 }
 0x15d   : > { %1808 = vmatmul.msk.bf16.vlgmr.msra.gmra.mxu3 %vm885_vm5, %v840_v38  ;;  %1790 = vmatmul.msk.bf16.vlgmr.msra.gmra.mxu1 %vm885_vm5, %v840_v38  ;;  %s2611_s19 = scalar_lea.vmem %s2610_s4, %s2609_s23  ;;  %s2614_s23 = scalar_lea.vmem %s2546_s9, %s2271_s25 }
 0x15e   : > { %v1965_v11 = vld [vmem:[%s2611_s19] ss:$0 sm:$0xff] }
 0x1d9   : > { %v898_v41 = vpop.f32.mrf.mxu0 }
 0x1da   : > { %v899_v42 = vadd.f32 %v1961_v39, %v898_v41  ;;  %v923_v43 = vpop.f32.mrf.mxu1 }
 0x1db   : > { %v924_v44 = vadd.f32 %v1962_v40, %v923_v43 }
 0x1dc   : > { %v977_v45 = vpack.c.bf16 %v899_v42, %v899_v42 }
 0x1dd   : > { %v978_v48 = vpack.c.bf16 %v924_v44, %v924_v44 }
 0x1de   : > { %v982_v49 = vunpack.c.l.b16 %v977_v45 }
 0x1df   : > { %v948_v50 = vpop.f32.mrf.mxu2  ;;  %v1007_v56 = vunpack.c.l.b16 %v978_v48 }
 0x1e0   : > { %v949_v51 = vadd.f32 %v1963_v46, %v948_v50  ;;  %v973_v52 = vpop.f32.mrf.mxu3  ;;  %v2372_v53 = vpack.c.b16 %v982_v49, %v982_v49 }
 0x1e1   : > { %v974_v54 = vadd.f32 %v1964_v47, %v973_v52  ;;  %v900_v55 = vpop.f32.mrf.mxu0  ;;  %v1008_v61 = vpack.c.b16 %v1007_v56, %v1007_v56 }
 0x1e2   : > { %v979_v57 = vpack.c.bf16 %v949_v51, %v949_v51  ;;  %984 = vrot.lane.b32.xlu1 %v2372_v53, %s2096_s17  ;;  %v925_v58 = vpop.f32.mrf.mxu1 }
 0x1e3   : > { %v980_v59 = vpack.c.bf16 %v974_v54, %v974_v54 }
 0x1e4   : > { %v1031_v60 = vunpack.c.l.b16 %v979_v57 }
 0x1e5   : > { %v1055_v0 = vunpack.c.l.b16 %v980_v59 }
 0x1e6   : > { %v1032_v62 = vpack.c.b16 %v1031_v60, %v1031_v60 }
 0x1e7   : > { %v950_v63 = vpop.f32.mrf.mxu2  ;;  %v1056_v2 = vpack.c.b16 %v1055_v0, %v1055_v0 }
 0x1e8   : > { %v975_v1 = vpop.f32.mrf.mxu3  ;;  %1033 = vrot.lane.b32.xlu0 %v1032_v62, %s2096_s17 }
 0x1ea   : > { %1009 = vrot.lane.b32.xlu1 %v1008_v61, %s2096_s17 }
 0x1f0   : > { %1057 = vrot.lane.b32.xlu0 %v1056_v2, %s2096_s17 }
 0x254   : > { %v985_v3 = vpop.permute.xlu1 %984 }
 0x255   : > { %v991_v4 = vsel %vm986_vm6, %v985_v3, 0 }
 0x256   : > { %1000 = vmatpush.bf16.xpose.msrb.mxu0 %v991_v4 }
 0x25a   : > { %v1034_v5 = vpop.permute.xlu0 %1033 }
 0x25b   : > { %v1039_v6 = vsel %vm986_vm6, %v1034_v5, 0 }
 0x25c   : > { %1048 = vmatpush.bf16.xpose.msrb.mxu2 %v1039_v6  ;;  %v1010_v7 = vpop.permute.xlu1 %1009 }
 0x25d   : > { %1809 = vmatmul.msk.bf16.vlgmr.msrb.gmra.mxu0 %vm986_vm6, %v977_v45  ;;  %v1015_v8 = vsel %vm986_vm6, %v1010_v7, 0 }
 0x25e   : > { %1024 = vmatpush.bf16.xpose.msrb.mxu1 %v1015_v8 }
 0x262   : > { %v1058_v9 = vpop.permute.xlu0 %1057 }
 0x263   : > { %1811 = vmatmul.msk.bf16.vlgmr.msrb.gmra.mxu2 %vm986_vm6, %v979_v57  ;;  %v1063_v10 = vsel %vm986_vm6, %v1058_v9, 0 }
 0x264   : > { %1072 = vmatpush.bf16.xpose.msrb.mxu3 %v1063_v10 }
 0x265   : > { %1810 = vmatmul.msk.bf16.vlgmr.msrb.gmra.mxu1 %vm986_vm6, %v978_v48 }
 0x26b   : > { %1812 = vmatmul.msk.bf16.vlgmr.msrb.gmra.mxu3 %vm986_vm6, %v980_v59 }
 0x2da   : > { %v1002_v12 = vpop.f32.mrf.mxu0 }
 0x2db   : > { %v1078_v13 = vmul.f32 0.35355338, %v1002_v12 }
 0x2dd   : > { %v1085_v14 = vadd.f32 %v1965_v11, %v1078_v13  ;;  %v1227_v13 = vld [vmem:[%s2612_s16 + $0x4] sm:$0xf] }
 0x2df   : > { %v1089_v15 = vsel %vm986_vm6, %v1085_v14, -inf }
 0x2e0   : > { %1090 = vmax.xlane.f32.xlu0 %v1089_v15  ;;  %v1228_v15 = vld [vmem:[%s2612_s16 + $0x8] sm:$0xf] }
 0x2e2   : > { %v1004_v16 = vpop.f32.mrf.mxu0  ;;  %v1026_v17 = vpop.f32.mrf.mxu1 }
 0x2e3   : > { %v1079_v18 = vmul.f32 0.35355338, %v1026_v17  ;;  %v1272_v16 = vsel %vm1142_vm7, %v1228_v15, 0  ;;  %v1229_v17 = vld [vmem:[%s2612_s16 + $0xc] sm:$0xf] }
 0x2e5   : > { %v1086_v19 = vadd.f32 %v1965_v11, %v1079_v18  ;;  %v1226_v18 = vld [vmem:[%s2612_s16] sm:$0xf]  ;;  %s2616_s16 = sld [smem:[#allocation8_spill]] }
 0x2e6   : > { %v1050_v20 = vpop.f32.mrf.mxu2 }
 0x2e7   : > { %v1080_v21 = vmul.f32 0.35355338, %v1050_v20  ;;  %v1092_v22 = vsel %vm986_vm6, %v1086_v19, -inf  ;;  %v1234_v20 = vsel %vm1142_vm7, %v1226_v18, 0  ;;  %v1876_v18 = vld [vmem:[%s2320_s29 + $0x18] sm:$0xff] }
 0x2e8   : > { %1093 = vmax.xlane.f32.xlu1 %v1092_v22 }
 0x2e9   : > { %v1087_v23 = vadd.f32 %v1965_v11, %v1080_v21 }
 0x2ea   : > { %v1028_v24 = vpop.f32.mrf.mxu1 }
 0x2eb   : > { %v1095_v25 = vsel %vm986_vm6, %v1087_v23, -inf  ;;  %p1847_p1 = scmp.ne.s32.totalorder %s2616_s16, 1 }
 0x2ec   : > { %1096 = vmax.xlane.f32.xlu2 %v1095_v25  ;;  %s2619_s27 = sld [smem:[#allocation29_spill]] (!%p1847_p1) }
 0x2ee   : > { %v1052_v26 = vpop.f32.mrf.mxu2  ;;  %v1074_v27 = vpop.f32.mrf.mxu3 }
 0x2ef   : > { %v1081_v28 = vmul.f32 0.35355338, %v1074_v27 }
 0x2f1   : > { %v1088_v29 = vadd.f32 %v1965_v11, %v1081_v28 }
 0x2f3   : > { %v1098_v30 = vsel %vm986_vm6, %v1088_v29, -inf }
 0x2f4   : > { %1099 = vmax.xlane.f32.xlu2 %v1098_v30 }
 0x2f6   : > { %v1076_v31 = vpop.f32.mrf.mxu3 }
 0x301   : > { %1201 = vrot.lane.b32.xlu1 %v1056_v2, %s2097_s5 }
 0x309   : > { %1159 = vrot.lane.b32.xlu1 %v1008_v61, %s2097_s5 }
 0x30c   : > { %1180 = vrot.lane.b32.xlu2 %v1032_v62, %s2097_s5 }
 0x353   : > { %v1091_v40 = vpop.xlane.xlu0 %1090 }
 0x354   : > { %v1101_v45 = vsub.f32 %v1085_v14, %v1091_v40  ;;  %v1253_v14 = vsel %vm1142_vm7, %v1227_v13, 0  ;;  %v1968_v13 = vld [vmem:[%s784_s26] ss:$0 sm:$0xff] }
 0x356   : > { %v1105_v48 = vmul.f32 1.442695, %v1101_v45  ;;  %v1966_v45 = vld [vmem:[%s2613_s1] ss:$0 sm:$0xff]  ;;  %s2617_s1 = sld [smem:[#allocation28_spill]] (!%p1847_p1) }
 0x35b   : > { %v1094_v32 = vpop.xlane.xlu1 %1093 }
 0x35c   : > { %v1102_v33 = vsub.f32 %v1086_v19, %v1094_v32  ;;  %v1291_v19 = vsel %vm1142_vm7, %v1229_v17, 0  ;;  %s2618_s21 = smov (!%p1847_p1), %s2617_s1 }
 0x35e   : > { %v1107_v34 = vmul.f32 1.442695, %v1102_v33 }
 0x35f   : > { %v1097_v35 = vpop.xlane.xlu2 %1096 }
 0x360   : > { %1973 = vpow2.f32 %v1107_v34  ;;  %v1103_v37 = vsub.f32 %v1087_v23, %v1097_v35 }
 0x362   : > { %v1109_v38 = vmul.f32 1.442695, %v1103_v37 }
 0x364   : > { %1975 = vpow2.f32 %v1109_v38 }
 0x366   : > { %v1974_v39 = vpop.eup %1973 }
 0x367   : > { %v1100_v41 = vpop.xlane.xlu2 %1099  ;;  %v1116_v42 = vsel %vm986_vm6, %v1974_v39, 0.0 }
 0x368   : > { %v1104_v43 = vsub.f32 %v1088_v29, %v1100_v41  ;;  %1117 = vadd.xlane.f32.xlu0 %v1116_v42 }
 0x36a   : > { %v1976_v44 = vpop.eup %1975  ;;  %v1111_v46 = vmul.f32 1.442695, %v1104_v43 }
 0x36b   : > { %v1119_v47 = vsel %vm986_vm6, %v1976_v44, 0.0 }
 0x36c   : > { %1977 = vpow2.f32 %v1111_v46  ;;  %1120 = vadd.xlane.f32.xlu2 %v1119_v47 }
 0x36d   : > { %1979 = vpow2.f32 %v1105_v48 }
 0x36f   : > { %v1181_v49 = vpop.permute.xlu2 %1180 }
 0x370   : > { %v1186_v50 = vsel %vm1142_vm7, %v1181_v49, 0 }
 0x371   : > { %1195 = vmatpush.bf16.msra.mxu2 %v1186_v50 }
 0x372   : > { %v1978_v51 = vpop.eup %1977 }
 0x373   : > { %v1202_v52 = vpop.permute.xlu1 %1201  ;;  %v1122_v54 = vsel %vm986_vm6, %v1978_v51, 0.0  ;;  %v1980_v56 = vpop.eup %1979 }
 0x374   : > { %v1207_v55 = vsel %vm1142_vm7, %v1202_v52, 0  ;;  %1123 = vadd.xlane.f32.xlu2 %v1122_v54  ;;  %v1113_v58 = vsel %vm986_vm6, %v1980_v56, 0.0  ;;  %v2098_v54 = vmov 32.0  }
 0x375   : > { %1216 = vmatpush.bf16.msra.mxu3 %v1207_v55  ;;  %1281 = vmatpush.bf16.msrb.mxu2 %v1272_v16 }
 0x379   : > { %1300 = vmatpush.bf16.msrb.mxu3 %v1291_v19  ;;  %v1875_v19 = vld [vmem:[%s2320_s29 + $0x10] sm:$0xff] }
 0x37b   : > { %v1160_v57 = vpop.permute.xlu1 %1159 }
 0x37c   : > { %v1165_v59 = vsel %vm1142_vm7, %v1160_v57, 0  ;;  %1114 = vadd.xlane.f32.xlu2 %v1113_v58  ;;  %1137 = vrot.lane.b32.xlu0 %v2372_v53, %s2097_s5 }
 0x37d   : > { %1174 = vmatpush.bf16.msra.mxu1 %v1165_v59 }
 0x381   : > { %1262 = vmatpush.bf16.msrb.mxu1 %v1253_v14 }
 0x3db   : > { %v1118_v60 = vpop.xlane.xlu0 %1117 }
 0x3dc   : > { %1981 = vrcp.f32 %v1118_v60 }
 0x3df   : > { %v1121_v61 = vpop.xlane.xlu2 %1120 }
 0x3e0   : > { %1983 = vrcp.f32 %v1121_v61 }
 0x3e2   : > { %v1982_v62 = vpop.eup %1981 }
 0x3e3   : > { %v1130_v63 = vmul.f32 %v1982_v62, %v1974_v39 }
 0x3e5   : > { %v1134_v0 = vpack.c.bf16 %v1130_v63, %v1130_v63 }
 0x3e6   : > { %v1984_v1 = vpop.eup %1983 }
 0x3e7   : > { %v1131_v2 = vmul.f32 %v1984_v1, %v1976_v44  ;;  %v1124_v3 = vpop.xlane.xlu2 %1123  ;;  %1814 = vmatmul.msk.bf16.vlgmr.msra.gmra.mxu1 %vm986_vm6, %v1134_v0  ;;  %v1872_v1 = vld [vmem:[%s2306_s24 + $0x8] sm:$0xff] }
 0x3e8   : > { %1985 = vrcp.f32 %v1124_v3  ;;  %1449 = vmatpush.bf16.msra.mxu1 %v1876_v18 }
 0x3e9   : > { %v1135_v4 = vpack.c.bf16 %v1131_v2, %v1131_v2  ;;  %v1871_v2 = vld [vmem:[%s2306_s24] sm:$0xff] }
 0x3eb   : > { %1815 = vmatmul.msk.bf16.vlgmr.msra.gmra.mxu2 %vm986_vm6, %v1135_v4 }
 0x3ec   : > { %1450 = vmatpush.bf16.msra.mxu1 %v1875_v19 }
 0x3ee   : > { %v1986_v5 = vpop.eup %1985  ;;  %v1138_v53 = vpop.permute.xlu0 %1137 }
 0x3ef   : > { %v1132_v6 = vmul.f32 %v1986_v5, %v1978_v51  ;;  %v1144_v7 = vsel %vm1142_vm7, %v1138_v53, 0  ;;  %v1115_v8 = vpop.xlane.xlu2 %1114 }
 0x3f0   : > { %1987 = vrcp.f32 %v1115_v8  ;;  %1153 = vmatpush.bf16.msra.mxu0 %v1144_v7 }
 0x3f1   : > { %v1136_v9 = vpack.c.bf16 %v1132_v6, %v1132_v6  ;;  %1989 = vrcp.f32 %v2098_v54 }
 0x3f3   : > { %1816 = vmatmul.msk.bf16.vlgmr.msra.gmra.mxu3 %vm986_vm6, %v1136_v9 }
 0x3f4   : > { %1243 = vmatpush.bf16.msrb.mxu0 %v1234_v20  ;;  %v1874_v20 = vld [vmem:[%s2320_s29 + $0x8] sm:$0xff] }
 0x3f5   : > { %1451 = vmatpush.bf16.msra.mxu1 %v1874_v20 }
 0x3f6   : > { %v1988_v10 = vpop.eup %1987 }
 0x3f7   : > { %v1129_v11 = vmul.f32 %v1988_v10, %v1980_v56  ;;  %v1990_v55 = vpop.eup %1989 }
 0x3f8   : > { %v1325_v56 = vmul.f32 32.0, %v1990_v55  ;;  %vm1329_vm8 = vweird.f32 %v1990_v55 }
 0x3f9   : > { %v1133_v12 = vpack.c.bf16 %v1129_v11, %v1129_v11  ;;  %v1967_v11 = vld [vmem:[%s781_s18] ss:$0 sm:$0xff] }
 0x3fa   : > { %v1326_v57 = vsub.f32 1.0, %v1325_v56 }
 0x3fb   : > { %1813 = vmatmul.msk.bf16.vlgmr.msra.gmra.mxu0 %vm986_vm6, %v1133_v12 }
 0x3fc   : > { %v1327_v58 = vmul.f32 %v1990_v55, %v1326_v57  ;;  %1388 = vmatpush.bf16.msra.mxu0 %v1872_v1 }
 0x3fe   : > { %v1328_v59 = vadd.f32 %v1990_v55, %v1327_v58  ;;  %v1971_v58 = vld [vmem:[%s787_s3] ss:$0 sm:$0xff] }
 0x400   : > { %v2432_v60 = vsel %vm1329_vm8, %v1990_v55, %v1328_v59  ;;  %1389 = vmatpush.bf16.msra.mxu0 %v1871_v2 }
 0x464   : > { %v1176_v21 = vpop.f32.mrf.mxu1 }
 0x465   : > { %v1223_v22 = vpack.c.bf16 %v1176_v21, %v1176_v21  ;;  %v1873_v21 = vld [vmem:[%s2320_s29] sm:$0xff] }
 0x466   : > { %1452 = vmatpush.bf16.msra.mxu1 %v1873_v21 }
 0x467   : > { %1818 = vmatmul.msk.bf16.vlgmr.msrb.gmra.mxu1 %vm986_vm6, %v1223_v22  ;;  %v1969_v22 = vld [vmem:[%s2614_s23] ss:$0 sm:$0xff] }
 0x46c   : > { %v1178_v23 = vpop.f32.mrf.mxu1 }
 0x46e   : > { %v1197_v24 = vpop.f32.mrf.mxu2 }
 0x46f   : > { %v1224_v25 = vpack.c.bf16 %v1197_v24, %v1197_v24 }
 0x471   : > { %1819 = vmatmul.msk.bf16.vlgmr.msrb.gmra.mxu2 %vm986_vm6, %v1224_v25 }
 0x476   : > { %v1199_v26 = vpop.f32.mrf.mxu2  ;;  %v1218_v27 = vpop.f32.mrf.mxu3 }
 0x477   : > { %v1225_v28 = vpack.c.bf16 %v1218_v27, %v1218_v27 }
 0x478   : > { %v1155_v29 = vpop.f32.mrf.mxu0 }
 0x479   : > { %v1222_v30 = vpack.c.bf16 %v1155_v29, %v1155_v29  ;;  %1820 = vmatmul.msk.bf16.vlgmr.msrb.gmra.mxu3 %vm986_vm6, %v1225_v28 }
 0x47b   : > { %1817 = vmatmul.msk.bf16.vlgmr.msrb.gmra.mxu0 %vm986_vm6, %v1222_v30 }
 0x47e   : > { %v1220_v31 = vpop.f32.mrf.mxu3 }
 0x480   : > { %v1157_v32 = vpop.f32.mrf.mxu0 }
 0x4e4   : > { %v1264_v33 = vpop.f32.mrf.mxu1 }
 0x4e5   : > { %v1307_v38 = vsel %vm885_vm5, %v1264_v33, 0.0 }
 0x4ec   : > { %v1266_v34 = vpop.f32.mrf.mxu1 }
 0x4f4   : > { %v1283_v35 = vpop.f32.mrf.mxu2 }
 0x4f5   : > { %v1309_v41 = vsel %vm885_vm5, %v1283_v35, 0.0 }
 0x4f8   : > { %v1245_v37 = vpop.f32.mrf.mxu0 }
 0x4f9   : > { %v1306_v39 = vsel %vm885_vm5, %v1245_v37, 0.0  ;;  %v1970_v37 = vld [vmem:[%s2615_s22] ss:$0 sm:$0xff] }
 0x4fa   : > { %v1308_v40 = vadd.f32 %v1307_v38, %v1306_v39 }
 0x4fc   : > { %v1285_v42 = vpop.f32.mrf.mxu2  ;;  %v1302_v43 = vpop.f32.mrf.mxu3  ;;  %v1310_v44 = vadd.f32 %v1309_v41, %v1308_v40 }
 0x4fd   : > { %v1311_v46 = vsel %vm885_vm5, %v1302_v43, 0.0 }
 0x4fe   : > { %v1312_v47 = vadd.f32 %v1311_v46, %v1310_v44 }
 0x500   : > { %v1317_v48 = vadd.f32 %v1966_v45, %v1312_v47  ;;  %v1247_v49 = vpop.f32.mrf.mxu0 }
 0x502   : > { %v1318_v50 = vadd.f32 %v1317_v48, %v2359_v36 }
 0x504   : > { %v1304_v51 = vpop.f32.mrf.mxu3  ;;  %v1321_v52 = vsel %vm885_vm5, %v1318_v50, 0.0 }
 0x505   : > { %1322 = vadd.xlane.f32.xlu0 %v1321_v52 }
 0x578   : > { %v1323_v61 = vpop.xlane.xlu0 %1322 }
 0x579   : > { %v1331_v62 = vmul.f32 %v2432_v60, %v1323_v61 }
 0x57b   : > { %v1332_v36 = vsub.f32 %v1318_v50, %v1331_v62 }
 0x57d   : > { %v1333_v63 = vmul.f32 %v1332_v36, %v1332_v36 }
 0x57f   : > { %v1334_v0 = vsel %vm885_vm5, %v1333_v63, 0.0 }
 0x580   : > { %1335 = vadd.xlane.f32.xlu1 %v1334_v0 }
 0x5f3   : > { %v1336_v3 = vpop.xlane.xlu1 %1335 }
 0x5f4   : > { %v1337_v4 = vmul.f32 %v1336_v3, %v2432_v60 }
 0x5f6   : > { %v1338_v5 = vadd.f32 1e-12, %v1337_v4 }
 0x5f8   : > { %1991 = vrsqrt.f32 %v1338_v5  ;;  %vm1345_vm10 = vweird.f32 %v1338_v5 }
 0x5fe   : > { %v1992_v53 = vpop.eup %1991 }
 0x5ff   : > { %v1340_v6 = vmul.f32 %v1992_v53, %v1338_v5  ;;  %vm1346_vm9 = vweird.f32 %v1992_v53 }
 0x600   : > { %vm1347_vm11 = vmor %vm1345_vm10, %vm1346_vm9 }
 0x601   : > { %v1341_v7 = vmul.f32 %v1992_v53, %v1340_v6 }
 0x603   : > { %v1342_v8 = vmul.f32 0.5, %v1341_v7 }
 0x605   : > { %v1343_v9 = vsub.f32 1.5, %v1342_v8 }
 0x607   : > { %v1344_v10 = vmul.f32 %v1992_v53, %v1343_v9 }
 0x609   : > { %v1348_v12 = vsel %vm1347_vm11, %v1992_v53, %v1344_v10 }
 0x60a   : > { %v1349_v14 = vmul.f32 %v1348_v12, %v1332_v36 }
 0x60c   : > { %v1353_v15 = vmul.f32 %v1967_v11, %v1349_v14 }
 0x60e   : > { %v1357_v16 = vadd.f32 %v1968_v13, %v1353_v15 }
 0x610   : > { %v1358_v17 = vpack.c.bf16 %v1357_v16, %v1357_v16 }
 0x612   : > { %1829 = vmatmul.msk.bf16.vlgmr.msra.gmra.mxu0 %vm885_vm5, %v1358_v17 }
 0x68f   : > { %v1391_v23 = vpop.f32.mrf.mxu0 }
 0x690   : > { %v1392_v24 = vadd.f32 %v1969_v22, %v1391_v23 }
 0x692   : > { %v1395_v25 = vmul.f32 %v1392_v24, %v1392_v24 }
 0x694   : > { %v1396_v26 = vmul.f32 %v1395_v25, %v1392_v24 }
 0x696   : > { %v1397_v27 = vmul.f32 0.044715, %v1396_v26 }
 0x697   : > { %v1393_v28 = vpop.f32.mrf.mxu0 }
 0x698   : > { %v1398_v29 = vadd.f32 %v1397_v27, %v1392_v24 }
 0x69a   : > { %v1399_v30 = vmul.f32 0.7978846, %v1398_v29 }
 0x69c   : > { %1993 = vtanh.f32 %v1399_v30 }
 0x6a2   : > { %v1994_v31 = vpop.eup %1993 }
 0x6a3   : > { %v1401_v32 = vadd.f32 1.0, %v1994_v31 }
 0x6a5   : > { %v1402_v33 = vmul.f32 0.5, %v1401_v32 }
 0x6a7   : > { %v1403_v34 = vmul.f32 %v1402_v33, %v1392_v24 }
 0x6a9   : > { %v1404_v35 = vpack.c.bf16 %v1403_v34, %v1403_v34 }
 0x6ab   : > { %1846 = vmatmul.msk.bf16.vlgmr.msra.gmra.mxu1 %vm1441_vm12, %v1404_v35 }
 0x728   : > { %v1454_v38 = vpop.f32.mrf.mxu1 }
 0x729   : > { %v1455_v39 = vadd.f32 %v1970_v37, %v1454_v38 }
 0x72b   : > { %v1458_v40 = vadd.f32 %v1455_v39, %v1357_v16 }
 0x72d   : > { %v1461_v41 = vsel %vm885_vm5, %v1458_v40, 0.0 }
 0x72e   : > { %1462 = vadd.xlane.f32.xlu2 %v1461_v41 }
 0x730   : > { %v1456_v42 = vpop.f32.mrf.mxu1 }
 0x7a1   : > { %v1463_v43 = vpop.xlane.xlu2 %1462 }
 0x7a2   : > { %v1464_v44 = vmul.f32 %v1463_v43, %v2432_v60 }
 0x7a4   : > { %v1465_v45 = vsub.f32 %v1458_v40, %v1464_v44 }
 0x7a6   : > { %v1466_v46 = vmul.f32 %v1465_v45, %v1465_v45 }
 0x7a8   : > { %v1467_v47 = vsel %vm885_vm5, %v1466_v46, 0.0 }
 0x7a9   : > { %1468 = vadd.xlane.f32.xlu2 %v1467_v47 }
 0x81c   : > { %v1469_v48 = vpop.xlane.xlu2 %1468 }
 0x81d   : > { %v1470_v49 = vmul.f32 %v1469_v48, %v2432_v60  ;;  %v1972_v60 = vld [vmem:[%s790_s30] ss:$0 sm:$0xff] }
 0x81f   : > { %v1471_v50 = vadd.f32 1e-12, %v1470_v49 }
 0x821   : > { %1995 = vrsqrt.f32 %v1471_v50  ;;  %vm1478_vm14 = vweird.f32 %v1471_v50 }
 0x827   : > { %v1996_v51 = vpop.eup %1995 }
 0x828   : > { %v1473_v52 = vmul.f32 %v1996_v51, %v1471_v50  ;;  %vm1479_vm13 = vweird.f32 %v1996_v51 }
 0x829   : > { %vm1480_vm15 = vmor %vm1478_vm14, %vm1479_vm13 }
 0x82a   : > { %v1474_v54 = vmul.f32 %v1996_v51, %v1473_v52 }
 0x82c   : > { %v1475_v55 = vmul.f32 0.5, %v1474_v54 }
 0x82e   : > { %v1476_v56 = vsub.f32 1.5, %v1475_v55 }
 0x830   : > { %v1477_v57 = vmul.f32 %v1996_v51, %v1476_v56 }
 0x832   : > { %v1481_v59 = vsel %vm1480_vm15, %v1996_v51, %v1477_v57 }
 0x833   : > { %v1482_v61 = vmul.f32 %v1481_v59, %v1465_v45 }
 0x835   : > { %v1486_v62 = vmul.f32 %v1971_v58, %v1482_v61  ;;  %1495 = sbr.rel (%p1847_p1) target bundleno = 2261 (0x8d5), region = 100 }
 0x837   : > { %v1490_v36 = vadd.f32 %v1972_v60, %v1486_v62 }
 0x839   : > { %1491 = vst.msk [vmem:[#allocation2] sm:$0xff] %vm885_vm5, %v1490_v36 }
 0x83a   : > { %v1878_v63 = vld [vmem:[%s2617_s1 + $0x8] sm:$0xff]  ;;  %v1496_v0 = vsel %vm885_vm5, %v1490_v36, 0.0  ;;  %v2099_v2 = vmov 8.0   ;;  %v1877_v3 = vld [vmem:[%s2618_s21] sm:$0xff] }
 0x83b   : > { %v1497_v1 = vrot.slane %v1496_v0, 4  ;;  %1997 = vrcp.f32 %v2099_v2  ;;  %1538 = vmatpush.bf16.msra.mxu0 %v1878_v63  ;;  %v1516_v16 = vld [vmem:[%s2619_s27] sm:$0x1] }
 0x83d   : > { %v1498_v4 = vadd.f32 %v1497_v1, %v1496_v0 }
 0x83f   : > { %v1499_v5 = vrot.slane %v1498_v4, 2  ;;  %1539 = vmatpush.bf16.msra.mxu0 %v1877_v3 }
 0x841   : > { %v1998_v53 = vpop.eup %1997  ;;  %v1500_v6 = vadd.f32 %v1499_v5, %v1498_v4 }
 0x842   : > { %v1504_v7 = vmul.f32 8.0, %v1998_v53  ;;  %vm1508_vm0 = vweird.f32 %v1998_v53 }
 0x843   : > { %v1501_v8 = vrot.slane %v1500_v6, 1 }
 0x844   : > { %v1505_v9 = vsub.f32 1.0, %v1504_v7 }
 0x845   : > { %v1502_v11 = vadd.f32 %v1501_v8, %v1500_v6 }
 0x846   : > { %v1506_v10 = vmul.f32 %v1998_v53, %v1505_v9 }
 0x848   : > { %v1507_v12 = vadd.f32 %v1998_v53, %v1506_v10 }
 0x84a   : > { %v1509_v13 = vsel %vm1508_vm0, %v1998_v53, %v1507_v12 }
 0x84b   : > { %v1510_v14 = vmul.f32 %v1509_v13, %v1502_v11 }
 0x84d   : > { %v1511_v15 = vpack.c.bf16 %v1510_v14, %v1510_v14 }
 0x84f   : > { %1856 = vmatmul.msk.bf16.vlgmr.msra.gmra.mxu0 %vm885_vm5, %v1511_v15 }
 0x8cc   : > { %v1541_v17 = vpop.f32.mrf.mxu0 }
 0x8cd   : > { %v1542_v18 = vadd.f32 %v1541_v17, %v1516_v16 }
 0x8cf   : > { %1545 = vst [vmem:[%s2340_s6] sm:$0x1] %v1542_v18 }
 0x8d4   : > { %v1543_v19 = vpop.f32.mrf.mxu0 }
 0x8d5 PF: > { %s2620_s2 = sld [smem:[#allocation9_spill]]  ;;  %s1557_s22 = sshll.u32 %s2340_s6, 4  ;;  %s1558_s22 = int_to_ptr.vmem [resolvable:$true] %s1557_s22 }
 0x8d6   : > { %s2621_s23 = sld [smem:[#allocation30_spill]]  ;;  %s2623_s4 = sand.u32 1, %s2069_s28  }
 0x8d7   : > { %s1547_s19 = scalar_lea.sflag [#allocation4], %s2623_s4 }
 0x8dc   : > { %s1555_s26 = scalar_lea.hbm %s2621_s23, %s2620_s2  ;;  %s2019_s1 = scalar_lea.hbm %s2621_s23, 2 }
 0x8dd   : > { %s1559_s0 = sshll.u32 %s1555_s26, 4  ;;  %s1560_s0 = int_to_ptr.hbm [resolvable:$true] %s1559_s0 }
 0x8de   : > { %s2013_s5 = sshra.s32 %s1560_s0, 4  ;;  %s2014_s5 = int_to_ptr.hbm [resolvable:$true] %s2013_s5 }
 0x8df   : > { %s2015_s16 = scalar_lea.hbm %s2014_s5, 1  ;;  %p2020_p6 = scmp.lt.s32.totalorder %s2014_s5, %s2621_s23 }
 0x8e0   : > { %p2016_p2 = scmp.ne.s32.totalorder %s2014_s5, %s2015_s16  ;;  %p2021_p7 = scmp.lt.s32.totalorder %s2019_s1, %s2015_s16 }
 0x8e2   : > { %p2017_p4 = pnand %p2016_p2, %p2244_p3  ;;  %p2022_p8 = por %p2021_p7, %p2020_p6 }
 0x8e4   : > { %p2018_p5 = pneg %p2017_p4 }
 0x8e6   : > { %p2023_p10 = pnand %p2022_p8, %p2018_p5 }
 0x8e8   : > { %2026 = shalt.err (!%p2023_p10)
}
 0x8e9   : > { %1879 = dma.vmem_to_hbm [thread:$0]  (%p2244_p3), %s1558_s22, 16, %s1560_s0, %s1547_s19  }
 0x8ea PF: > { %s2624_s6 = sld [smem:[#allocation12_spill]] }
 0x8eb   : > { %s2625_s30 = sld [smem:[#allocation6_spill]] }
 0x8f0   : > { %p1885_p11 = scmp.ge.s32.totalorder %s2624_s6, 2 }
 0x8f1   : > { %s1571_s27 = sand.u32 1, %s2625_s30  }
 0x8f2   : > { %p1882_p12 = pnand %p1885_p11, %p2254_p9  ;;  %s1572_s2 = scalar_lea.sflag [#allocation4], %s1571_s27 }
 0x8f4   : > { %p1883_p13 = pneg %p1882_p12 }
 0x8f6   : > { %2060 = dma.done.wait (%p1883_p13), %s1572_s2, 16  }
 0x8f7   : > { %2062 = vsyncadd (%p1883_p13), %s1572_s2, 4294967280  ;;  %s31_s20 = sadd.s32 1, %s2624_s6   ;;  %s2627_s18 = sld [smem:[#allocation7_spill]] }
 0x8f8   : > { %p28_p0 = scmp.ge.s32.totalorder %s31_s20, 6   ;;  %s2628_s29 = sld [smem:[#allocation17_spill]] }
 0x8f9   : > { %s2629_s30 = sld [smem:[#allocation10_spill]]  ;;  %s2633_s27 = smov %s2069_s28 }
 0x8fa   : > { %s2630_s0 = sld [smem:[#allocation11_spill]]  ;;  %30 = sbr.rel (!%p28_p0) target bundleno = 17 (0x11), region = 174 }
 0x8fb   : > { %s2631_s19 = sld [smem:[#allocation13_spill]] }
 0x8fc   : > { %s2632_s1 = sld [smem:[#allocation15_spill]] }
 0x8fd   : > { %s2634_s28 = smov %s2627_s18 }
 0x8ff   :  { %1577 = vsyncpa [#allocation4], 1 }
 0x900   :  { %1579 = vsyncpa [#allocation4 + $0x1], 1 }

</bundles_post_ra>
